<compile_context>
chip_gen: v6e
topology: v6e:2x2x1
jax: 0.10.0
libtpu: 0.0.40
codegen_flags: <defaults>
</compile_context>

<pallas_src>
import functools

import jax
import jax.numpy as jnp
from jax.experimental import pallas as pl
from jax.experimental.pallas import tpu as pltpu


def _round_up(x, m):
    return (x + m - 1) // m * m


def _vmem_budget_bytes():
    """Per-generation VMEM budget (v5e/v6e: 128 MiB physical, v7x: 64 MiB per TC)."""
    try:
        cap = int(pltpu.get_tpu_info().vmem_capacity_bytes)
    except Exception:  # interpret mode / older runtimes: assume v7x-sized VMEM
        cap = 64 * 1024 * 1024
    return max(32 * 1024 * 1024, min(int(cap * 0.75), 100 * 1024 * 1024))


def _pick_tile_rows(n_rows, cin, coutp, in_bytes, w_bytes, out_bytes, vmem_budget):
    """Largest row tile (prefer 512-1024) whose double-buffered working set fits VMEM."""
    cin_v = _round_up(max(cin, 1), 128)          # lane padding of the VMEM tile
    tm = 128
    for cand in (1024, 512, 256, 128):
        need = (2 * cand * cin_v * in_bytes      # double-buffered activation tiles
                + 2 * cand * coutp * out_bytes   # double-buffered output tiles
                + cand * coutp * 4               # f32 accumulator
                + 2 * cin_v * coutp * w_bytes    # resident weight (worst case 2 bufs)
                + 2 * coutp * 4)                 # bias
        if need <= vmem_budget:
            tm = cand
            break
    tm = min(tm, _round_up(n_rows, 8))
    # Keep both v7x TensorCores busy when there is enough work to split.
    if n_rows >= 1024 and pl.cdiv(n_rows, tm) < 2:
        tm = _round_up(pl.cdiv(n_rows, 2), 128)
    return max(tm, 8)


# ----------------------------------------------------------------------------- kernels


def _mm_bias_relu_kernel(x_ref, w_ref, b_ref, o_ref):
    """1x1 conv path: (TM, Cin) @ (Cin, Coutp) + bias, ReLU.  Cast to MXU dtype in-kernel."""
    a = x_ref[...].astype(w_ref.dtype)
    acc = jnp.dot(a, w_ref[...], preferred_element_type=jnp.float32)
    o_ref[...] = jnp.maximum(acc + b_ref[...], 0.0).astype(o_ref.dtype)


def _tap_conv_kernel(x_ref, w_ref, b_ref, o_ref, acc_ref, *,
                     KH, KW, stride, Hq, Ho, Wo):
    """General KxK conv for one sample: in-kernel tap expansion, f32 VMEM accumulator.

    x_ref: (stride^2 * Hq, Wq, Cin) phase-stacked, spatially padded NHWC input (one N).
    w_ref: (KH*KW, Cin, Coutp) BN-folded weights.   o_ref: (Ho*Wo, Coutp).
    All tap slices are unit-stride (stride handled by the phase stacking), so each tap is
    a plain sub-block load feeding one MXU contraction over Cin.
    """
    s = stride
    acc_ref[...] = jnp.zeros_like(acc_ref)
    for kh in range(KH):
        for kw in range(KW):
            t = kh * KW + kw
            phase = (kh % s) * s + (kw % s)
            r0 = phase * Hq + kh // s
            c0 = kw // s
            xs = x_ref[pl.ds(r0, Ho), pl.ds(c0, Wo), :]          # (Ho, Wo, Cin)
            # NOTE: free re-tiling when Wo % 8 == 0 (true for OSNet feature maps).
            a = xs.reshape(Ho * Wo, xs.shape[-1]).astype(w_ref.dtype)
            acc_ref[...] += jnp.dot(a, w_ref[t],
                                    preferred_element_type=jnp.float32)
    o_ref[...] = jnp.maximum(acc_ref[...] + b_ref[...], 0.0).astype(o_ref.dtype)


# -------------------------------------------------------------------------- path glue


def _conv1x1_path(x_nhwc, w2d, bias_p, *, stride, out_dtype, vmem_budget):
    """1x1 conv: pure matmul over flat rows; no im2col, no activation padding/copies."""
    if stride > 1:
        x_nhwc = x_nhwc[:, ::stride, ::stride, :]
    N, Ho, Wo, Cin = x_nhwc.shape
    Coutp = w2d.shape[1]
    rows = N * Ho * Wo
    x2d = x_nhwc.reshape(rows, Cin)              # reshape only, no data movement

    tm = _pick_tile_rows(rows, Cin, Coutp,
                         jnp.dtype(x2d.dtype).itemsize,
                         jnp.dtype(w2d.dtype).itemsize,
                         jnp.dtype(out_dtype).itemsize,
                         vmem_budget)
    out = pl.pallas_call(
        _mm_bias_relu_kernel,
        out_shape=jax.ShapeDtypeStruct((rows, Coutp), out_dtype),
        grid=(pl.cdiv(rows, tm),),
        in_specs=[
            pl.BlockSpec((tm, Cin), lambda i: (i, 0)),
            # constant index maps -> weight/bias DMA'd once and stay resident
            pl.BlockSpec((Cin, Coutp), lambda i: (0, 0)),
            pl.BlockSpec((1, Coutp), lambda i: (0, 0)),
        ],
        out_specs=pl.BlockSpec((tm, Coutp), lambda i: (i, 0)),
        compiler_params=pltpu.CompilerParams(
            dimension_semantics=("parallel",),
            vmem_limit_bytes=int(vmem_budget)),
    )(x2d, w2d, bias_p)
    return out.reshape(N, Ho, Wo, Coutp)


def _conv_taps_path(x_nhwc, w_taps, bias_p, *, KH, KW, stride, padding,
                    out_dtype, vmem_budget):
    """General KxK conv: whole padded sample in VMEM, taps expanded inside the kernel."""
    N, H, W, Cin = x_nhwc.shape
    Coutp = w_taps.shape[-1]
    s = stride
    Ho = (H + 2 * padding - KH) // s + 1
    Wo = (W + 2 * padding - KW) // s + 1
    Hq = (KH - 1) // s + Ho
    Wq = (KW - 1) // s + Wo
    M = Ho * Wo

    x_pad = x_nhwc
    if padding > 0:
        x_pad = jnp.pad(x_nhwc,
                        ((0, 0), (padding, padding), (padding, padding), (0, 0)))

    if s == 1:
        x_ph = x_pad                              # Hq == Hp, Wq == Wp: no copy needed
        n_phase = 1
    else:
        # Phase-split (space-to-phase) once so every in-kernel tap slice is unit-stride.
        # Total size ~1x the padded input (stacked along the H axis), not KH*KW x.
        phases = []
        for a in range(s):
            for b in range(s):
                ph = x_pad[:, a::s, b::s, :][:, :Hq, :Wq, :]
                ph = jnp.pad(ph, ((0, 0), (0, Hq - ph.shape[1]),
                                  (0, Wq - ph.shape[2]), (0, 0)))
                phases.append(ph)
        x_ph = jnp.concatenate(phases, axis=1)    # (N, s*s*Hq, Wq, Cin)
        n_phase = s * s

    kernel = functools.partial(_tap_conv_kernel, KH=KH, KW=KW, stride=s,
                               Hq=Hq, Ho=Ho, Wo=Wo)
    out = pl.pallas_call(
        kernel,
        out_shape=jax.ShapeDtypeStruct((N, M, Coutp), out_dtype),
        grid=(N,),
        in_specs=[
            pl.BlockSpec((None, n_phase * Hq, Wq, Cin), lambda n: (n, 0, 0, 0)),
            pl.BlockSpec((KH * KW, Cin, Coutp), lambda n: (0, 0, 0)),
            pl.BlockSpec((1, Coutp), lambda n: (0, 0)),
        ],
        out_specs=pl.BlockSpec((None, M, Coutp), lambda n: (n, 0, 0)),
        scratch_shapes=[pltpu.VMEM((M, Coutp), jnp.float32)],
        compiler_params=pltpu.CompilerParams(
            dimension_semantics=("parallel",),
            vmem_limit_bytes=int(vmem_budget)),
    )(x_ph, w_taps, bias_p)
    return out.reshape(N, Ho, Wo, Coutp)


# ----------------------------------------------------------------------- public entry


def conv_layer_forward_nhwc(x_nhwc, w_oihw, gamma, beta, running_mean,
                            running_var, *, stride=1, padding=0, eps=1e-5,
                            compute_dtype=None):
    """ConvLayer.forward (groups=1, IN=False, BatchNorm in eval mode), NHWC activations.

    compute_dtype: dtype fed to the MXU (None -> x.dtype).  Pass jnp.bfloat16 for
    inference to halve VMEM/HBM bytes and hit the native MXU rate on v6e/v7x;
    accumulation, bias and ReLU stay in f32 either way.
    """
    N, H, W, Cin = x_nhwc.shape
    Cout, Cin_w, KH, KW = w_oihw.shape
    assert Cin == Cin_w, "groups != 1 not supported"

    out_dtype = x_nhwc.dtype
    k_dtype = (jnp.dtype(compute_dtype) if compute_dtype is not None
               else jnp.dtype(out_dtype))
    vmem_budget = _vmem_budget_bytes()

    # ---- fold BatchNorm (eval, running stats) into conv weight + bias (f32, exact) ----
    s_bn = gamma.astype(jnp.float32) * jax.lax.rsqrt(
        running_var.astype(jnp.float32) + eps)
    bias = beta.astype(jnp.float32) - running_mean.astype(jnp.float32) * s_bn
    w_hwio = jnp.transpose(w_oihw, (2, 3, 1, 0)).astype(jnp.float32)
    w_fold = w_hwio * s_bn[None, None, None, :]              # (KH, KW, Cin, Cout)

    # Lane-dense Cout so output stores are unmasked; sliced off at the end.
    Coutp = _round_up(Cout, 128)
    bias_p = jnp.pad(bias, (0, Coutp - Cout)).reshape(1, Coutp)

    if KH == 1 and KW == 1 and padding == 0:
        w2d = jnp.pad(w_fold[0, 0], ((0, 0), (0, Coutp - Cout))).astype(k_dtype)
        out = _conv1x1_path(x_nhwc, w2d, bias_p, stride=stride,
                            out_dtype=out_dtype, vmem_budget=vmem_budget)
    else:
        w_taps = jnp.pad(w_fold.reshape(KH * KW, Cin, Cout),
                         ((0, 0), (0, 0), (0, Coutp - Cout))).astype(k_dtype)
        out = _conv_taps_path(x_nhwc, w_taps, bias_p, KH=KH, KW=KW,
                              stride=stride, padding=padding,
                              out_dtype=out_dtype, vmem_budget=vmem_budget)
    return out[..., :Cout]


def conv_layer_forward(x_nchw, w_oihw, gamma, beta, running_mean, running_var,
                       *, stride=1, padding=0, eps=1e-5, compute_dtype=None):
    """PyTorch-layout (NCHW) wrapper matching ConvLayer.forward.

    In a full model keep activations NHWC end-to-end and call
    conv_layer_forward_nhwc directly so these per-layer relayout transposes disappear.
    """
    x_nhwc = jnp.transpose(x_nchw, (0, 2, 3, 1))
    y = conv_layer_forward_nhwc(x_nhwc, w_oihw, gamma, beta, running_mean,
                                running_var, stride=stride, padding=padding,
                                eps=eps, compute_dtype=compute_dtype)
    return jnp.transpose(y, (0, 3, 1, 2))


# --------------------------------------------------------------------------- reference


def _reference(x_nchw, w_oihw, gamma, beta, mean, var, *, stride, padding, eps):
    """Pure-JAX reference (XLA conv + eval-mode BN + ReLU) for verification."""
    y = jax.lax.conv_general_dilated(
        x_nchw.astype(jnp.float32), w_oihw.astype(jnp.float32),
        window_strides=(stride, stride),
        padding=[(padding, padding), (padding, padding)],
        dimension_numbers=("NCHW", "OIHW", "NCHW"),
        precision=jax.lax.Precision.HIGHEST)
    inv = jax.lax.rsqrt(var.astype(jnp.float32) + eps)
    y = (y - mean[None, :, None, None]) * (gamma * inv)[None, :, None, None] \
        + beta[None, :, None, None]
    return jnp.maximum(y, 0.0)


if __name__ == "__main__":
    key = jax.random.PRNGKey(0)
    eps = 1e-5

    def make_params(cin, cout, k, pkey):
        kw_, kg, kb, km, kv = jax.random.split(pkey, 5)
        w = jax.random.normal(kw_, (cout, cin, k, k), jnp.float32) * 0.1
        gamma = 1.0 + 0.1 * jax.random.normal(kg, (cout,), jnp.float32)
        beta = 0.1 * jax.random.normal(kb, (cout,), jnp.float32)
        mean = 0.1 * jax.random.normal(km, (cout,), jnp.float32)
        var = 1.0 + 0.1 * jax.random.uniform(kv, (cout,), jnp.float32)
        return w, gamma, beta, mean, var

    fwd = jax.jit(conv_layer_forward,
                  static_argnames=("stride", "padding", "eps", "compute_dtype"))

    kx1, kp1, kx2, kp2, kx3, kp3 = jax.random.split(key, 6)

    # ConvLayer(4, 8, 3, stride=1, padding=1): general in-kernel-tap path.
    x1 = jax.random.normal(kx1, (2, 4, 16, 16), jnp.float32)
    p1 = make_params(4, 8, 3, kp1)
    # ConvLayer(4, 8, 1): 1x1 fast path (flat rows, no im2col, no padding copies).
    x2 = jax.random.normal(kx2, (2, 4, 16, 16), jnp.float32)
    p2 = make_params(4, 8, 1, kp2)
    # ConvLayer(3, 8, 7, stride=2, padding=3): OSNet-stem-like shape, phase-split path.
    x3 = jax.random.normal(kx3, (2, 3, 16, 16), jnp.float32)
    p3 = make_params(3, 8, 7, kp3)

    cases = [
        ("3x3/s1/p1 f32", x1, p1, dict(stride=1, padding=1), None, 1e-4),
        ("1x1/s1/p0 f32", x2, p2, dict(stride=1, padding=0), None, 1e-4),
        ("7x7/s2/p3 f32", x3, p3, dict(stride=2, padding=3), None, 1e-4),
        ("3x3/s1/p1 bf16", x1, p1, dict(stride=1, padding=1), jnp.bfloat16, 5e-2),
    ]

    for name, x, p, cfg, cdt, tol in cases:
        out = jax.block_until_ready(fwd(x, *p, eps=eps, compute_dtype=cdt, **cfg))
        ref = _reference(x, *p, eps=eps, **cfg)
        assert out.shape == ref.shape, (name, out.shape, ref.shape)
        max_err = float(jnp.max(jnp.abs(out - ref)))
        assert jnp.allclose(out, ref, atol=tol, rtol=tol), (name, max_err)

    print("KERNEL_OK")
</pallas_src>

<mosaic_0001>
module attributes {stable_mosaic.version = 11 : i64} {
  func.func @_tap_conv_kernel(%arg0: i32, %arg1: memref<1x18x18x4xf32, #tpu.memory_space<vmem>>, %arg2: memref<9x4x128xf32, #tpu.memory_space<vmem>>, %arg3: memref<1x128xf32, #tpu.memory_space<vmem>>, %arg4: memref<1x256x128xf32, #tpu.memory_space<vmem>>, %arg5: memref<256x128xf32, #tpu.memory_space<vmem>>) attributes {dimension_semantics = [#tpu.dimension_semantics<parallel>], iteration_bounds = array<i64: 2>, scalar_prefetch = 0 : i64, scratch_operands = 1 : i64, tpu.core_type = #tpu.core_type<tc>, window_params = [{transform_indices = @transform_0, window_bounds = array<i64: 1, 18, 18, 4>}, {pipeline_mode = #tpu.pipeline_mode<synchronous>, transform_indices = @transform_1, window_bounds = array<i64: 9, 4, 128>}, {pipeline_mode = #tpu.pipeline_mode<synchronous>, transform_indices = @transform_2, window_bounds = array<i64: 1, 128>}, {transform_indices = @transform_3, window_bounds = array<i64: 1, 256, 128>}]} {
    %cst = arith.constant 0.000000e+00 : f32
    %0 = vector.broadcast %cst : f32 to vector<256x128xf32>
    %c0 = arith.constant 0 : index
    %c0_0 = arith.constant 0 : index
    %1 = vector.load %arg5[%c0, %c0_0] : memref<256x128xf32, #tpu.memory_space<vmem>>, vector<256x128xf32>
    tpu.vector_store %arg5[%c0, %c0_0], %0 {strides = array<i32>} : memref<256x128xf32, #tpu.memory_space<vmem>>, vector<256x128xf32>,
    %c0_1 = arith.constant 0 : index
    %c0_2 = arith.constant 0 : index
    %c0_3 = arith.constant 0 : index
    %c0_4 = arith.constant 0 : index
    %2 = vector.load %arg1[%c0_1, %c0_2, %c0_3, %c0_4] : memref<1x18x18x4xf32, #tpu.memory_space<vmem>>, vector<1x16x16x4xf32>
    %3 = vector.shape_cast %2 : vector<1x16x16x4xf32> to vector<16x16x4xf32>
    %4 = vector.shape_cast %3 : vector<16x16x4xf32> to vector<256x4xf32>
    %c0_5 = arith.constant 0 : index
    %c0_6 = arith.constant 0 : index
    %5 = vector.load %arg5[%c0_5, %c0_6] : memref<256x128xf32, #tpu.memory_space<vmem>>, vector<256x128xf32>
    %c0_7 = arith.constant 0 : index
    %c0_8 = arith.constant 0 : index
    %c0_9 = arith.constant 0 : index
    %6 = vector.load %arg2[%c0_7, %c0_8, %c0_9] : memref<9x4x128xf32, #tpu.memory_space<vmem>>, vector<1x4x128xf32>
    %7 = vector.shape_cast %6 : vector<1x4x128xf32> to vector<4x128xf32>
    %cst_10 = arith.constant dense<0.000000e+00> : vector<256x128xf32>
    %8 = tpu.matmul %4, %7, %cst_10 {dimension_numbers = #tpu.dot_dimension_numbers<[1], [0], [0], [1], [0, 0, 1, 1], [], []>} : vector<256x4xf32>, vector<4x128xf32>, vector<256x128xf32> -> vector<256x128xf32>
    %9 = arith.addf %5, %8 : vector<256x128xf32>
    %c0_11 = arith.constant 0 : index
    %c0_12 = arith.constant 0 : index
    %10 = vector.load %arg5[%c0_11, %c0_12] : memref<256x128xf32, #tpu.memory_space<vmem>>, vector<256x128xf32>
    tpu.vector_store %arg5[%c0_11, %c0_12], %9 {strides = array<i32>} : memref<256x128xf32, #tpu.memory_space<vmem>>, vector<256x128xf32>,
    %c0_13 = arith.constant 0 : index
    %c0_14 = arith.constant 0 : index
    %c1 = arith.constant 1 : index
    %c0_15 = arith.constant 0 : index
    %11 = vector.load %arg1[%c0_13, %c0_14, %c1, %c0_15] : memref<1x18x18x4xf32, #tpu.memory_space<vmem>>, vector<1x16x16x4xf32>
    %12 = vector.shape_cast %11 : vector<1x16x16x4xf32> to vector<16x16x4xf32>
    %13 = vector.shape_cast %12 : vector<16x16x4xf32> to vector<256x4xf32>
    %c0_16 = arith.constant 0 : index
    %c0_17 = arith.constant 0 : index
    %14 = vector.load %arg5[%c0_16, %c0_17] : memref<256x128xf32, #tpu.memory_space<vmem>>, vector<256x128xf32>
    %c1_18 = arith.constant 1 : index
    %c0_19 = arith.constant 0 : index
    %c0_20 = arith.constant 0 : index
    %15 = vector.load %arg2[%c1_18, %c0_19, %c0_20] : memref<9x4x128xf32, #tpu.memory_space<vmem>>, vector<1x4x128xf32>
    %16 = vector.shape_cast %15 : vector<1x4x128xf32> to vector<4x128xf32>
    %cst_21 = arith.constant dense<0.000000e+00> : vector<256x128xf32>
    %17 = tpu.matmul %13, %16, %cst_21 {dimension_numbers = #tpu.dot_dimension_numbers<[1], [0], [0], [1], [0, 0, 1, 1], [], []>} : vector<256x4xf32>, vector<4x128xf32>, vector<256x128xf32> -> vector<256x128xf32>
    %18 = arith.addf %14, %17 : vector<256x128xf32>
    %c0_22 = arith.constant 0 : index
    %c0_23 = arith.constant 0 : index
    %19 = vector.load %arg5[%c0_22, %c0_23] : memref<256x128xf32, #tpu.memory_space<vmem>>, vector<256x128xf32>
    tpu.vector_store %arg5[%c0_22, %c0_23], %18 {strides = array<i32>} : memref<256x128xf32, #tpu.memory_space<vmem>>, vector<256x128xf32>,
    %c0_24 = arith.constant 0 : index
    %c0_25 = arith.constant 0 : index
    %c2 = arith.constant 2 : index
    %c0_26 = arith.constant 0 : index
    %20 = vector.load %arg1[%c0_24, %c0_25, %c2, %c0_26] : memref<1x18x18x4xf32, #tpu.memory_space<vmem>>, vector<1x16x16x4xf32>
    %21 = vector.shape_cast %20 : vector<1x16x16x4xf32> to vector<16x16x4xf32>
    %22 = vector.shape_cast %21 : vector<16x16x4xf32> to vector<256x4xf32>
    %c0_27 = arith.constant 0 : index
    %c0_28 = arith.constant 0 : index
    %23 = vector.load %arg5[%c0_27, %c0_28] : memref<256x128xf32, #tpu.memory_space<vmem>>, vector<256x128xf32>
    %c2_29 = arith.constant 2 : index
    %c0_30 = arith.constant 0 : index
    %c0_31 = arith.constant 0 : index
    %24 = vector.load %arg2[%c2_29, %c0_30, %c0_31] : memref<9x4x128xf32, #tpu.memory_space<vmem>>, vector<1x4x128xf32>
    %25 = vector.shape_cast %24 : vector<1x4x128xf32> to vector<4x128xf32>
    %cst_32 = arith.constant dense<0.000000e+00> : vector<256x128xf32>
    %26 = tpu.matmul %22, %25, %cst_32 {dimension_numbers = #tpu.dot_dimension_numbers<[1], [0], [0], [1], [0, 0, 1, 1], [], []>} : vector<256x4xf32>, vector<4x128xf32>, vector<256x128xf32> -> vector<256x128xf32>
    %27 = arith.addf %23, %26 : vector<256x128xf32>
    %c0_33 = arith.constant 0 : index
    %c0_34 = arith.constant 0 : index
    %28 = vector.load %arg5[%c0_33, %c0_34] : memref<256x128xf32, #tpu.memory_space<vmem>>, vector<256x128xf32>
    tpu.vector_store %arg5[%c0_33, %c0_34], %27 {strides = array<i32>} : memref<256x128xf32, #tpu.memory_space<vmem>>, vector<256x128xf32>,
    %c0_35 = arith.constant 0 : index
    %c1_36 = arith.constant 1 : index
    %c0_37 = arith.constant 0 : index
    %c0_38 = arith.constant 0 : index
    %29 = vector.load %arg1[%c0_35, %c1_36, %c0_37, %c0_38] : memref<1x18x18x4xf32, #tpu.memory_space<vmem>>, vector<1x16x16x4xf32>
    %30 = vector.shape_cast %29 : vector<1x16x16x4xf32> to vector<16x16x4xf32>
    %31 = vector.shape_cast %30 : vector<16x16x4xf32> to vector<256x4xf32>
    %c0_39 = arith.constant 0 : index
    %c0_40 = arith.constant 0 : index
    %32 = vector.load %arg5[%c0_39, %c0_40] : memref<256x128xf32, #tpu.memory_space<vmem>>, vector<256x128xf32>
    %c3 = arith.constant 3 : index
    %c0_41 = arith.constant 0 : index
    %c0_42 = arith.constant 0 : index
    %33 = vector.load %arg2[%c3, %c0_41, %c0_42] : memref<9x4x128xf32, #tpu.memory_space<vmem>>, vector<1x4x128xf32>
    %34 = vector.shape_cast %33 : vector<1x4x128xf32> to vector<4x128xf32>
    %cst_43 = arith.constant dense<0.000000e+00> : vector<256x128xf32>
    %35 = tpu.matmul %31, %34, %cst_43 {dimension_numbers = #tpu.dot_dimension_numbers<[1], [0], [0], [1], [0, 0, 1, 1], [], []>} : vector<256x4xf32>, vector<4x128xf32>, vector<256x128xf32> -> vector<256x128xf32>
    %36 = arith.addf %32, %35 : vector<256x128xf32>
    %c0_44 = arith.constant 0 : index
    %c0_45 = arith.constant 0 : index
    %37 = vector.load %arg5[%c0_44, %c0_45] : memref<256x128xf32, #tpu.memory_space<vmem>>, vector<256x128xf32>
    tpu.vector_store %arg5[%c0_44, %c0_45], %36 {strides = array<i32>} : memref<256x128xf32, #tpu.memory_space<vmem>>, vector<256x128xf32>,
    %c0_46 = arith.constant 0 : index
    %c1_47 = arith.constant 1 : index
    %c1_48 = arith.constant 1 : index
    %c0_49 = arith.constant 0 : index
    %38 = vector.load %arg1[%c0_46, %c1_47, %c1_48, %c0_49] : memref<1x18x18x4xf32, #tpu.memory_space<vmem>>, vector<1x16x16x4xf32>
    %39 = vector.shape_cast %38 : vector<1x16x16x4xf32> to vector<16x16x4xf32>
    %40 = vector.shape_cast %39 : vector<16x16x4xf32> to vector<256x4xf32>
    %c0_50 = arith.constant 0 : index
    %c0_51 = arith.constant 0 : index
    %41 = vector.load %arg5[%c0_50, %c0_51] : memref<256x128xf32, #tpu.memory_space<vmem>>, vector<256x128xf32>
    %c4 = arith.constant 4 : index
    %c0_52 = arith.constant 0 : index
    %c0_53 = arith.constant 0 : index
    %42 = vector.load %arg2[%c4, %c0_52, %c0_53] : memref<9x4x128xf32, #tpu.memory_space<vmem>>, vector<1x4x128xf32>
    %43 = vector.shape_cast %42 : vector<1x4x128xf32> to vector<4x128xf32>
    %cst_54 = arith.constant dense<0.000000e+00> : vector<256x128xf32>
    %44 = tpu.matmul %40, %43, %cst_54 {dimension_numbers = #tpu.dot_dimension_numbers<[1], [0], [0], [1], [0, 0, 1, 1], [], []>} : vector<256x4xf32>, vector<4x128xf32>, vector<256x128xf32> -> vector<256x128xf32>
    %45 = arith.addf %41, %44 : vector<256x128xf32>
    %c0_55 = arith.constant 0 : index
    %c0_56 = arith.constant 0 : index
    %46 = vector.load %arg5[%c0_55, %c0_56] : memref<256x128xf32, #tpu.memory_space<vmem>>, vector<256x128xf32>
    tpu.vector_store %arg5[%c0_55, %c0_56], %45 {strides = array<i32>} : memref<256x128xf32, #tpu.memory_space<vmem>>, vector<256x128xf32>,
    %c0_57 = arith.constant 0 : index
    %c1_58 = arith.constant 1 : index
    %c2_59 = arith.constant 2 : index
    %c0_60 = arith.constant 0 : index
    %47 = vector.load %arg1[%c0_57, %c1_58, %c2_59, %c0_60] : memref<1x18x18x4xf32, #tpu.memory_space<vmem>>, vector<1x16x16x4xf32>
    %48 = vector.shape_cast %47 : vector<1x16x16x4xf32> to vector<16x16x4xf32>
    %49 = vector.shape_cast %48 : vector<16x16x4xf32> to vector<256x4xf32>
    %c0_61 = arith.constant 0 : index
    %c0_62 = arith.constant 0 : index
    %50 = vector.load %arg5[%c0_61, %c0_62] : memref<256x128xf32, #tpu.memory_space<vmem>>, vector<256x128xf32>
    %c5 = arith.constant 5 : index
    %c0_63 = arith.constant 0 : index
    %c0_64 = arith.constant 0 : index
    %51 = vector.load %arg2[%c5, %c0_63, %c0_64] : memref<9x4x128xf32, #tpu.memory_space<vmem>>, vector<1x4x128xf32>
    %52 = vector.shape_cast %51 : vector<1x4x128xf32> to vector<4x128xf32>
    %cst_65 = arith.constant dense<0.000000e+00> : vector<256x128xf32>
    %53 = tpu.matmul %49, %52, %cst_65 {dimension_numbers = #tpu.dot_dimension_numbers<[1], [0], [0], [1], [0, 0, 1, 1], [], []>} : vector<256x4xf32>, vector<4x128xf32>, vector<256x128xf32> -> vector<256x128xf32>
    %54 = arith.addf %50, %53 : vector<256x128xf32>
    %c0_66 = arith.constant 0 : index
    %c0_67 = arith.constant 0 : index
    %55 = vector.load %arg5[%c0_66, %c0_67] : memref<256x128xf32, #tpu.memory_space<vmem>>, vector<256x128xf32>
    tpu.vector_store %arg5[%c0_66, %c0_67], %54 {strides = array<i32>} : memref<256x128xf32, #tpu.memory_space<vmem>>, vector<256x128xf32>,
    %c0_68 = arith.constant 0 : index
    %c2_69 = arith.constant 2 : index
    %c0_70 = arith.constant 0 : index
    %c0_71 = arith.constant 0 : index
    %56 = vector.load %arg1[%c0_68, %c2_69, %c0_70, %c0_71] : memref<1x18x18x4xf32, #tpu.memory_space<vmem>>, vector<1x16x16x4xf32>
    %57 = vector.shape_cast %56 : vector<1x16x16x4xf32> to vector<16x16x4xf32>
    %58 = vector.shape_cast %57 : vector<16x16x4xf32> to vector<256x4xf32>
    %c0_72 = arith.constant 0 : index
    %c0_73 = arith.constant 0 : index
    %59 = vector.load %arg5[%c0_72, %c0_73] : memref<256x128xf32, #tpu.memory_space<vmem>>, vector<256x128xf32>
    %c6 = arith.constant 6 : index
    %c0_74 = arith.constant 0 : index
    %c0_75 = arith.constant 0 : index
    %60 = vector.load %arg2[%c6, %c0_74, %c0_75] : memref<9x4x128xf32, #tpu.memory_space<vmem>>, vector<1x4x128xf32>
    %61 = vector.shape_cast %60 : vector<1x4x128xf32> to vector<4x128xf32>
    %cst_76 = arith.constant dense<0.000000e+00> : vector<256x128xf32>
    %62 = tpu.matmul %58, %61, %cst_76 {dimension_numbers = #tpu.dot_dimension_numbers<[1], [0], [0], [1], [0, 0, 1, 1], [], []>} : vector<256x4xf32>, vector<4x128xf32>, vector<256x128xf32> -> vector<256x128xf32>
    %63 = arith.addf %59, %62 : vector<256x128xf32>
    %c0_77 = arith.constant 0 : index
    %c0_78 = arith.constant 0 : index
    %64 = vector.load %arg5[%c0_77, %c0_78] : memref<256x128xf32, #tpu.memory_space<vmem>>, vector<256x128xf32>
    tpu.vector_store %arg5[%c0_77, %c0_78], %63 {strides = array<i32>} : memref<256x128xf32, #tpu.memory_space<vmem>>, vector<256x128xf32>,
    %c0_79 = arith.constant 0 : index
    %c2_80 = arith.constant 2 : index
    %c1_81 = arith.constant 1 : index
    %c0_82 = arith.constant 0 : index
    %65 = vector.load %arg1[%c0_79, %c2_80, %c1_81, %c0_82] : memref<1x18x18x4xf32, #tpu.memory_space<vmem>>, vector<1x16x16x4xf32>
    %66 = vector.shape_cast %65 : vector<1x16x16x4xf32> to vector<16x16x4xf32>
    %67 = vector.shape_cast %66 : vector<16x16x4xf32> to vector<256x4xf32>
    %c0_83 = arith.constant 0 : index
    %c0_84 = arith.constant 0 : index
    %68 = vector.load %arg5[%c0_83, %c0_84] : memref<256x128xf32, #tpu.memory_space<vmem>>, vector<256x128xf32>
    %c7 = arith.constant 7 : index
    %c0_85 = arith.constant 0 : index
    %c0_86 = arith.constant 0 : index
    %69 = vector.load %arg2[%c7, %c0_85, %c0_86] : memref<9x4x128xf32, #tpu.memory_space<vmem>>, vector<1x4x128xf32>
    %70 = vector.shape_cast %69 : vector<1x4x128xf32> to vector<4x128xf32>
    %cst_87 = arith.constant dense<0.000000e+00> : vector<256x128xf32>
    %71 = tpu.matmul %67, %70, %cst_87 {dimension_numbers = #tpu.dot_dimension_numbers<[1], [0], [0], [1], [0, 0, 1, 1], [], []>} : vector<256x4xf32>, vector<4x128xf32>, vector<256x128xf32> -> vector<256x128xf32>
    %72 = arith.addf %68, %71 : vector<256x128xf32>
    %c0_88 = arith.constant 0 : index
    %c0_89 = arith.constant 0 : index
    %73 = vector.load %arg5[%c0_88, %c0_89] : memref<256x128xf32, #tpu.memory_space<vmem>>, vector<256x128xf32>
    tpu.vector_store %arg5[%c0_88, %c0_89], %72 {strides = array<i32>} : memref<256x128xf32, #tpu.memory_space<vmem>>, vector<256x128xf32>,
    %c0_90 = arith.constant 0 : index
    %c2_91 = arith.constant 2 : index
    %c2_92 = arith.constant 2 : index
    %c0_93 = arith.constant 0 : index
    %74 = vector.load %arg1[%c0_90, %c2_91, %c2_92, %c0_93] : memref<1x18x18x4xf32, #tpu.memory_space<vmem>>, vector<1x16x16x4xf32>
    %75 = vector.shape_cast %74 : vector<1x16x16x4xf32> to vector<16x16x4xf32>
    %76 = vector.shape_cast %75 : vector<16x16x4xf32> to vector<256x4xf32>
    %c0_94 = arith.constant 0 : index
    %c0_95 = arith.constant 0 : index
    %77 = vector.load %arg5[%c0_94, %c0_95] : memref<256x128xf32, #tpu.memory_space<vmem>>, vector<256x128xf32>
    %c8 = arith.constant 8 : index
    %c0_96 = arith.constant 0 : index
    %c0_97 = arith.constant 0 : index
    %78 = vector.load %arg2[%c8, %c0_96, %c0_97] : memref<9x4x128xf32, #tpu.memory_space<vmem>>, vector<1x4x128xf32>
    %79 = vector.shape_cast %78 : vector<1x4x128xf32> to vector<4x128xf32>
    %cst_98 = arith.constant dense<0.000000e+00> : vector<256x128xf32>
    %80 = tpu.matmul %76, %79, %cst_98 {dimension_numbers = #tpu.dot_dimension_numbers<[1], [0], [0], [1], [0, 0, 1, 1], [], []>} : vector<256x4xf32>, vector<4x128xf32>, vector<256x128xf32> -> vector<256x128xf32>
    %81 = arith.addf %77, %80 : vector<256x128xf32>
    %c0_99 = arith.constant 0 : index
    %c0_100 = arith.constant 0 : index
    %82 = vector.load %arg5[%c0_99, %c0_100] : memref<256x128xf32, #tpu.memory_space<vmem>>, vector<256x128xf32>
    tpu.vector_store %arg5[%c0_99, %c0_100], %81 {strides = array<i32>} : memref<256x128xf32, #tpu.memory_space<vmem>>, vector<256x128xf32>,
    %c0_101 = arith.constant 0 : index
    %c0_102 = arith.constant 0 : index
    %83 = vector.load %arg5[%c0_101, %c0_102] : memref<256x128xf32, #tpu.memory_space<vmem>>, vector<256x128xf32>
    %c0_103 = arith.constant 0 : index
    %c0_104 = arith.constant 0 : index
    %84 = vector.load %arg3[%c0_103, %c0_104] : memref<1x128xf32, #tpu.memory_space<vmem>>, vector<1x128xf32>
    %85 = vector.broadcast %84 : vector<1x128xf32> to vector<256x128xf32>
    %86 = arith.addf %83, %85 : vector<256x128xf32>
    %cst_105 = arith.constant 0.000000e+00 : f32
    %87 = vector.broadcast %cst_105 : f32 to vector<256x128xf32>
    %88 = arith.maximumf %86, %87 : vector<256x128xf32>
    %c0_106 = arith.constant 0 : index
    %c0_107 = arith.constant 0 : index
    %c0_108 = arith.constant 0 : index
    %89 = vector.load %arg4[%c0_106, %c0_107, %c0_108] : memref<1x256x128xf32, #tpu.memory_space<vmem>>, vector<1x256x128xf32>
    %90 = vector.shape_cast %89 : vector<1x256x128xf32> to vector<256x128xf32>
    %91 = vector.shape_cast %88 : vector<256x128xf32> to vector<1x256x128xf32>
    tpu.vector_store %arg4[%c0_106, %c0_107, %c0_108], %91 {strides = array<i32>} : memref<1x256x128xf32, #tpu.memory_space<vmem>>, vector<1x256x128xf32>,
    return
  }
  func.func @transform_0(%arg0: i32) -> (i32, i32, i32, i32) {
    %c0_i32 = arith.constant 0 : i32
    %c0_i32_0 = arith.constant 0 : i32
    %c0_i32_1 = arith.constant 0 : i32
    %c0_i32_2 = arith.constant 0 : i32
    return %arg0, %c0_i32, %c0_i32_0, %c0_i32_1 : i32, i32, i32, i32
  }
  func.func @transform_1(%arg0: i32) -> (i32, i32, i32) {
    %c0_i32 = arith.constant 0 : i32
    %c0_i32_0 = arith.constant 0 : i32
    %c0_i32_1 = arith.constant 0 : i32
    %c0_i32_2 = arith.constant 0 : i32
    return %c0_i32, %c0_i32_0, %c0_i32_1 : i32, i32, i32
  }
  func.func @transform_2(%arg0: i32) -> (i32, i32) {
    %c0_i32 = arith.constant 0 : i32
    %c0_i32_0 = arith.constant 0 : i32
    %c0_i32_1 = arith.constant 0 : i32
    return %c0_i32, %c0_i32_0 : i32, i32
  }
  func.func @transform_3(%arg0: i32) -> (i32, i32, i32) {
    %c0_i32 = arith.constant 0 : i32
    %c0_i32_0 = arith.constant 0 : i32
    %c0_i32_1 = arith.constant 0 : i32
    return %arg0, %c0_i32, %c0_i32_0 : i32, i32, i32
  }
}

</mosaic_0001>

<bundles_post_ra>
// kernel: conv_layer_forward.1
= control target key start
LH: loop header
LB: loop body
LE: loop exit
PB: predicated region body
PF: predicated region fallthrough
CT: control target
= control target key end

     0   :  { %s5777_s12 = smov 0   ;;  %s7280_s0 = inlined_call_operand.vmem [shape: f32[2,18,18,4], index: 0, kind: input, shape index: {}]   ;;  %s7281_s1 = inlined_call_operand.vmem [shape: f32[9,4,128], index: 1, kind: input, shape index: {}]   ;;  %s7282_s2 = inlined_call_operand.vmem [shape: f32[1,128], index: 2, kind: input, shape index: {}]   ;;  %s7283_s3 = inlined_call_operand.vmem [shape: f32[2,256,128], index: 3, kind: output, shape index: {}]  }
   0x1 LB: > { %s4482_s13 = sadd.s32 4294967295, %s5755_s12   ;;  %p4486_p0 = scmp.ge.s32.totalorder %s5755_s12, 1  ;;  %s5755_s12 = sphi %s5777_s12, %s13_s12  }
   0x2   : > { %p137_p1 = scmp.lt.s32.totalorder %s5755_s12, 3 }
   0x4   : > { %p138_p2 = pnand %p4486_p0, %p137_p1 }
   0x6   : > { %141 = sbr.rel (%p138_p2) target bundleno = 508 (0x1fc), region = 32 }
   0xb   : > { %v267_v0 = vld [vmem:[%s7281_s1] sm:$0xf]  ;;  %vm365_vm0 = vcmask 1043456   ;;  %p161_p3 = scmp.lt.s32.totalorder %s4482_s13, 1  ;;  %v4523_v1 = vld [vmem:[%s7281_s1 + $0x4] sm:$0xf] }
   0xc   : > { %5738 = vmatprep.subr.msk.mxu1 %vm365_vm0, %v267_v0  ;;  %5288 = vmatprep.subr.msk.mxu0 %vm365_vm0, %v267_v0  ;;  %v4557_v2 = vld [vmem:[%s7281_s1 + $0x8] sm:$0xf]  ;;  %vm268_vm1 = vcmask 31744   ;;  %v5831_v9 = vld [vmem:[%s7281_s1 + $0xc] sm:$0xf] }
   0xd   : > { %5739 = vmatpush3.msk.msra.mxu1 %vm365_vm0, %v267_v0  ;;  %5289 = vmatpush3.msk.msra.mxu0 %vm365_vm0, %v267_v0  ;;  %s7550_s13 = smov (!%p161_p3, %s4482_s13), 1  ;;  %v5836_v10 = vld [vmem:[%s7281_s1 + $0x10] sm:$0xf]  ;;  %v5995_v43 = vld [vmem:[%s7281_s1 + $0x14] sm:$0xf] }
   0xe   : > { %5338 = vmatprep.subr.msk.mxu1 %vm365_vm0, %v4523_v1  ;;  %5388 = vmatprep.subr.msk.mxu0 %vm365_vm0, %v4557_v2  ;;  %s5740_s20 = smul.u32 432, %s7550_s13  ;;  %v6000_v44 = vld [vmem:[%s7281_s1 + $0x18] sm:$0xf]  ;;  %s4990_s11 = sshll.u32 %s7550_s13, 8 }
   0xf   : > { %s7135_s15 = scalar_lea.vmem %s7283_s3, %s4990_s11 }
  0x10   : > { %s5806_s23 = scalar_lea.vmem %s7280_s0, %s5740_s20 }
  0x11   : > { %v203_v3 = vld [vmem:[%s5806_s23] sm:$0xff]  ;;  %v204_v5 = vld [vmem:[%s5806_s23 + $0x8] sm:$0xff]  ;;  %v5820_v7 = vld [vmem:[%s5806_s23 + $0x18] sm:$0xff] }
  0x12   : > { %v5810_v4 = vld [vmem:[%s5806_s23 + $0xc0] sm:$0xff]  ;;  %5290 = vmatprep.mubr.msk.f32.mxu0 %vm268_vm1, %v203_v3  ;;  %v5817_v6 = vld [vmem:[%s5806_s23 + $0xc8] sm:$0xff]  ;;  %v5823_v8 = vld [vmem:[%s5806_s23 + $0xd8] sm:$0xff] }
  0x13   : > { %5314 = vmatprep.mubr.msk.f32.mxu1 %vm268_vm1, %v5810_v4  ;;  %5291 = vmatmul.mubr.msk.f32.vlgmr.msra.gmra.mxu0 %vm268_vm1, %v204_v5  ;;  %v5841_v11 = vld [vmem:[%s5806_s23 + $0x20] sm:$0xff]  ;;  %v5851_v13 = vld [vmem:[%s5806_s23 + $0x30] sm:$0xff]  ;;  %v5869_v15 = vld [vmem:[%s5806_s23 + $0x38] sm:$0xff] }
  0x14   : > { %5315 = vmatmul.mubr.msk.f32.vlgmr.msra.gmra.mxu1 %vm268_vm1, %v5817_v6  ;;  %5389 = vmatpush3.msk.msra.mxu0 %vm365_vm0, %v4557_v2  ;;  %v5844_v12 = vld [vmem:[%s5806_s23 + $0xe0] sm:$0xff]  ;;  %v5854_v14 = vld [vmem:[%s5806_s23 + $0xf0] sm:$0xff]  ;;  %v5872_v16 = vld [vmem:[%s5806_s23 + $0xf8] sm:$0xff] }
  0x15   : > { %5339 = vmatpush3.msk.msra.mxu1 %vm365_vm0, %v4523_v1  ;;  %5293 = vmatprep.mubr.msk.f32.mxu0 %vm268_vm1, %v5820_v7  ;;  %v5875_v17 = vld [vmem:[%s5806_s23 + $0x48] sm:$0xff]  ;;  %v5889_v19 = vld [vmem:[%s5806_s23 + $0x50] sm:$0xff]  ;;  %v5895_v21 = vld [vmem:[%s5806_s23 + $0x60] sm:$0xff] }
  0x16   : > { %5317 = vmatprep.mubr.msk.f32.mxu1 %vm268_vm1, %v5823_v8  ;;  %5438 = vmatprep.subr.msk.mxu1 %vm365_vm0, %v5831_v9  ;;  %v5878_v18 = vld [vmem:[%s5806_s23 + $0x108] sm:$0xff]  ;;  %v5892_v20 = vld [vmem:[%s5806_s23 + $0x110] sm:$0xff]  ;;  %v5898_v22 = vld [vmem:[%s5806_s23 + $0x120] sm:$0xff] }
  0x17   : > { %5488 = vmatprep.subr.msk.mxu0 %vm365_vm0, %v5836_v10  ;;  %5294 = vmatmul.mubr.msk.f32.gmra.mxu0 %vm268_vm1, %v5841_v11  ;;  %v5909_v23 = vld [vmem:[%s5806_s23 + $0x68] sm:$0xff]  ;;  %v5915_v25 = vld [vmem:[%s5806_s23 + $0x78] sm:$0xff]  ;;  %v5929_v27 = vld [vmem:[%s5806_s23 + $0x80] sm:$0xff] }
  0x18   : > { %5318 = vmatmul.mubr.msk.f32.gmra.mxu1 %vm268_vm1, %v5844_v12  ;;  %5296 = vmatprep.mubr.msk.f32.mxu0 %vm268_vm1, %v5851_v13  ;;  %v5912_v24 = vld [vmem:[%s5806_s23 + $0x128] sm:$0xff]  ;;  %v5918_v26 = vld [vmem:[%s5806_s23 + $0x138] sm:$0xff]  ;;  %v5932_v28 = vld [vmem:[%s5806_s23 + $0x140] sm:$0xff] }
  0x19   : > { %5320 = vmatprep.mubr.msk.f32.mxu1 %vm268_vm1, %v5854_v14  ;;  %v5935_v29 = vld [vmem:[%s5806_s23 + $0x90] sm:$0xff]  ;;  %v5949_v31 = vld [vmem:[%s5806_s23 + $0x98] sm:$0xff]  ;;  %v5955_v33 = vld [vmem:[%s5806_s23 + $0xa8] sm:$0xff] }
  0x1a   : > { %v5938_v30 = vld [vmem:[%s5806_s23 + $0x150] sm:$0xff]  ;;  %v5952_v32 = vld [vmem:[%s5806_s23 + $0x158] sm:$0xff]  ;;  %v5958_v34 = vld [vmem:[%s5806_s23 + $0x168] sm:$0xff] }
  0x1b   : > { %5297 = vmatmul.mubr.msk.f32.gmra.mxu0 %vm268_vm1, %v5869_v15  ;;  %v5969_v35 = vld [vmem:[%s5806_s23 + $0xb0] sm:$0xff]  ;;  %v658_v37 = vld [vmem:[%s5806_s23 + $0x1] sm:$0xff]  ;;  %v5985_v41 = vld [vmem:[%s5806_s23 + $0x19] sm:$0xff] }
  0x1c   : > { %5321 = vmatmul.mubr.msk.f32.gmra.mxu1 %vm268_vm1, %v5872_v16  ;;  %5299 = vmatprep.mubr.msk.f32.mxu0 %vm268_vm1, %v5875_v17  ;;  %v5972_v36 = vld [vmem:[%s5806_s23 + $0x170] sm:$0xff]  ;;  %v1112_v38 = vld [vmem:[%s5806_s23 + $0x2] sm:$0xff]  ;;  %v5988_v42 = vld [vmem:[%s5806_s23 + $0x1a] sm:$0xff] }
  0x1d   : > { %5323 = vmatprep.mubr.msk.f32.mxu1 %vm268_vm1, %v5878_v18  ;;  %7351 = vst [vmem:[#allocation3_spill] sm:$0xff] %v5972_v36  ;;  %v659_v39 = vld [vmem:[%s5806_s23 + $0x9] sm:$0xff]  ;;  %7352 = vst [vmem:[#allocation4_spill] sm:$0xff] %v5988_v42  ;;  %v6007_v45 = vld [vmem:[%s5806_s23 + $0x21] sm:$0xff] }
  0x1e   : > { %v1113_v40 = vld [vmem:[%s5806_s23 + $0xa] sm:$0xff]  ;;  %v6010_v46 = vld [vmem:[%s5806_s23 + $0x22] sm:$0xff]  ;;  %v6020_v48 = vld [vmem:[%s5806_s23 + $0x32] sm:$0xff] }
  0x1f   : > { %5300 = vmatmul.mubr.msk.f32.gmra.mxu0 %vm268_vm1, %v5889_v19  ;;  %7353 = vst [vmem:[#allocation5_spill] sm:$0xff] %v6010_v46  ;;  %v6017_v47 = vld [vmem:[%s5806_s23 + $0x31] sm:$0xff]  ;;  %7354 = vst [vmem:[#allocation6_spill] sm:$0xff] %v6020_v48  ;;  %v6035_v49 = vld [vmem:[%s5806_s23 + $0x39] sm:$0xff] }
  0x20   : > { %5324 = vmatmul.mubr.msk.f32.gmra.mxu1 %vm268_vm1, %v5892_v20  ;;  %5302 = vmatprep.mubr.msk.f32.mxu0 %vm268_vm1, %v5895_v21  ;;  %v6038_v50 = vld [vmem:[%s5806_s23 + $0x3a] sm:$0xff]  ;;  %v6041_v51 = vld [vmem:[%s5806_s23 + $0x49] sm:$0xff]  ;;  %v6055_v53 = vld [vmem:[%s5806_s23 + $0x51] sm:$0xff] }
  0x21   : > { %5326 = vmatprep.mubr.msk.f32.mxu1 %vm268_vm1, %v5898_v22  ;;  %7355 = vst [vmem:[#allocation7_spill] sm:$0xff] %v6038_v50  ;;  %v6044_v52 = vld [vmem:[%s5806_s23 + $0x4a] sm:$0xff]  ;;  %v6058_v54 = vld [vmem:[%s5806_s23 + $0x52] sm:$0xff]  ;;  %v6061_v55 = vld [vmem:[%s5806_s23 + $0x61] sm:$0xff] }
  0x22   : > { %7356 = vst [vmem:[#allocation8_spill] sm:$0xff] %v6044_v52  ;;  %7357 = vst [vmem:[#allocation9_spill] sm:$0xff] %v6058_v54  ;;  %v6064_v56 = vld [vmem:[%s5806_s23 + $0x62] sm:$0xff]  ;;  %v6078_v58 = vld [vmem:[%s5806_s23 + $0x6a] sm:$0xff] }
  0x23   : > { %5303 = vmatmul.mubr.msk.f32.gmra.mxu0 %vm268_vm1, %v5909_v23  ;;  %7358 = vst [vmem:[#allocation10_spill] sm:$0xff] %v6064_v56  ;;  %v6075_v57 = vld [vmem:[%s5806_s23 + $0x69] sm:$0xff]  ;;  %7359 = vst [vmem:[#allocation11_spill] sm:$0xff] %v6078_v58  ;;  %v6081_v59 = vld [vmem:[%s5806_s23 + $0x79] sm:$0xff] }
  0x24   : > { %5327 = vmatmul.mubr.msk.f32.gmra.mxu1 %vm268_vm1, %v5912_v24  ;;  %5305 = vmatprep.mubr.msk.f32.mxu0 %vm268_vm1, %v5915_v25  ;;  %v6084_v60 = vld [vmem:[%s5806_s23 + $0x7a] sm:$0xff]  ;;  %v6098_v62 = vld [vmem:[%s5806_s23 + $0x82] sm:$0xff]  ;;  %v6101_v63 = vld [vmem:[%s5806_s23 + $0x91] sm:$0xff] }
  0x25   : > { %5329 = vmatprep.mubr.msk.f32.mxu1 %vm268_vm1, %v5918_v26  ;;  %7360 = vst [vmem:[#allocation12_spill] sm:$0xff] %v6084_v60  ;;  %v6095_v61 = vld [vmem:[%s5806_s23 + $0x81] sm:$0xff]  ;;  %7361 = vst [vmem:[#allocation13_spill] sm:$0xff] %v6098_v62  ;;  %v6104_v0 = vld [vmem:[%s5806_s23 + $0x92] sm:$0xff] }
  0x26   : > { %7362 = vst [vmem:[#allocation14_spill] sm:$0xff] %v6104_v0  ;;  %v6115_v1 = vld [vmem:[%s5806_s23 + $0x99] sm:$0xff]  ;;  %v6121_v3 = vld [vmem:[%s5806_s23 + $0xa9] sm:$0xff] }
  0x27   : > { %5306 = vmatmul.mubr.msk.f32.gmra.mxu0 %vm268_vm1, %v5929_v27  ;;  %v6118_v2 = vld [vmem:[%s5806_s23 + $0x9a] sm:$0xff]  ;;  %v6124_v5 = vld [vmem:[%s5806_s23 + $0xaa] sm:$0xff] }
  0x28   : > { %5330 = vmatmul.mubr.msk.f32.gmra.mxu1 %vm268_vm1, %v5932_v28  ;;  %5308 = vmatprep.mubr.msk.f32.mxu0 %vm268_vm1, %v5935_v29  ;;  %7363 = vst [vmem:[#allocation15_spill] sm:$0xff] %v6118_v2  ;;  %7364 = vst [vmem:[#allocation16_spill] sm:$0xff] %v6124_v5 }
  0x29   : > { %5332 = vmatprep.mubr.msk.f32.mxu1 %vm268_vm1, %v5938_v30 }
  0x2b   : > { %5309 = vmatmul.mubr.msk.f32.gmra.mxu0 %vm268_vm1, %v5949_v31 }
  0x2c   : > { %5333 = vmatmul.mubr.msk.f32.gmra.mxu1 %vm268_vm1, %v5952_v32  ;;  %5311 = vmatprep.mubr.msk.f32.mxu0 %vm268_vm1, %v5955_v33 }
  0x2d   : > { %5335 = vmatprep.mubr.msk.f32.mxu1 %vm268_vm1, %v5958_v34 }
  0x2f   : > { %5312 = vmatmul.mubr.msk.f32.gmra.mxu0 %vm268_vm1, %v5969_v35 }
  0x30   : > { %5336 = vmatmul.mubr.msk.f32.gmra.mxu1 %vm268_vm1, %v5972_v36  ;;  %5390 = vmatprep.mubr.msk.f32.mxu0 %vm268_vm1, %v1112_v38  ;;  %v6144_v38 = vld [vmem:[%s5806_s23 + $0xc2] sm:$0xff]  ;;  %v6284_v36 = vld [vmem:[%s5806_s23 + $0x16a] sm:$0xff] }
  0x31   : > { %5340 = vmatprep.mubr.msk.f32.mxu1 %vm268_vm1, %v658_v37  ;;  %v6141_v37 = vld [vmem:[%s5806_s23 + $0xc1] sm:$0xff]  ;;  %7366 = vst [vmem:[#allocation18_spill] sm:$0xff] %v6144_v38  ;;  %7386 = vst [vmem:[#allocation38_spill] sm:$0xff] %v6284_v36 }
  0x33   : > { %5391 = vmatmul.mubr.msk.f32.vlgmr.msra.gmra.mxu0 %vm268_vm1, %v1113_v40  ;;  %v6158_v40 = vld [vmem:[%s5806_s23 + $0xca] sm:$0xff] }
  0x34   : > { %5341 = vmatmul.mubr.msk.f32.vlgmr.msra.gmra.mxu1 %vm268_vm1, %v659_v39  ;;  %5489 = vmatpush3.msk.msra.mxu0 %vm365_vm0, %v5836_v10  ;;  %v6138_v10 = vld [vmem:[%s5806_s23 + $0xb2] sm:$0xff]  ;;  %v6155_v39 = vld [vmem:[%s5806_s23 + $0xc9] sm:$0xff]  ;;  %7367 = vst [vmem:[#allocation19_spill] sm:$0xff] %v6158_v40 }
  0x35   : > { %5439 = vmatpush3.msk.msra.mxu1 %vm365_vm0, %v5831_v9  ;;  %5343 = vmatprep.mubr.msk.f32.mxu1 %vm268_vm1, %v5985_v41  ;;  %v6135_v9 = vld [vmem:[%s5806_s23 + $0xb1] sm:$0xff]  ;;  %7365 = vst [vmem:[#allocation17_spill] sm:$0xff] %v6138_v10 }
  0x36   : > { %5393 = vmatprep.mubr.msk.f32.mxu0 %vm268_vm1, %v5988_v42  ;;  %5538 = vmatprep.subr.msk.mxu1 %vm365_vm0, %v5995_v43  ;;  %v6281_v42 = vld [vmem:[%s5806_s23 + $0x169] sm:$0xff] }
  0x37   : > { %5588 = vmatprep.subr.msk.mxu0 %vm365_vm0, %v6000_v44  ;;  %5394 = vmatmul.mubr.msk.f32.gmra.mxu0 %vm268_vm1, %v6010_v46  ;;  %v6264_v46 = vld [vmem:[%s5806_s23 + $0x152] sm:$0xff] }
  0x38   : > { %5344 = vmatmul.mubr.msk.f32.gmra.mxu1 %vm268_vm1, %v6007_v45  ;;  %5396 = vmatprep.mubr.msk.f32.mxu0 %vm268_vm1, %v6020_v48  ;;  %v6261_v48 = vld [vmem:[%s5806_s23 + $0x151] sm:$0xff]  ;;  %7383 = vst [vmem:[#allocation35_spill] sm:$0xff] %v6264_v46 }
  0x39   : > { %5346 = vmatprep.mubr.msk.f32.mxu1 %vm268_vm1, %v6017_v47  ;;  %7382 = vst [vmem:[#allocation34_spill] sm:$0xff] %v6261_v48 }
  0x3b   : > { %5397 = vmatmul.mubr.msk.f32.gmra.mxu0 %vm268_vm1, %v6038_v50  ;;  %v6244_v50 = vld [vmem:[%s5806_s23 + $0x13a] sm:$0xff] }
  0x3c   : > { %5347 = vmatmul.mubr.msk.f32.gmra.mxu1 %vm268_vm1, %v6035_v49  ;;  %5399 = vmatprep.mubr.msk.f32.mxu0 %vm268_vm1, %v6044_v52  ;;  %v6241_v52 = vld [vmem:[%s5806_s23 + $0x139] sm:$0xff]  ;;  %7379 = vst [vmem:[#allocation31_spill] sm:$0xff] %v6244_v50 }
  0x3d   : > { %5349 = vmatprep.mubr.msk.f32.mxu1 %vm268_vm1, %v6041_v51  ;;  %7378 = vst [vmem:[#allocation30_spill] sm:$0xff] %v6241_v52 }
  0x3f   : > { %5400 = vmatmul.mubr.msk.f32.gmra.mxu0 %vm268_vm1, %v6058_v54  ;;  %v6224_v54 = vld [vmem:[%s5806_s23 + $0x122] sm:$0xff] }
  0x40   : > { %5350 = vmatmul.mubr.msk.f32.gmra.mxu1 %vm268_vm1, %v6055_v53  ;;  %5402 = vmatprep.mubr.msk.f32.mxu0 %vm268_vm1, %v6064_v56  ;;  %v6221_v56 = vld [vmem:[%s5806_s23 + $0x121] sm:$0xff]  ;;  %7375 = vst [vmem:[#allocation27_spill] sm:$0xff] %v6224_v54 }
  0x41   : > { %5352 = vmatprep.mubr.msk.f32.mxu1 %vm268_vm1, %v6061_v55  ;;  %7374 = vst [vmem:[#allocation26_spill] sm:$0xff] %v6221_v56 }
  0x43   : > { %5403 = vmatmul.mubr.msk.f32.gmra.mxu0 %vm268_vm1, %v6078_v58  ;;  %v6204_v58 = vld [vmem:[%s5806_s23 + $0x10a] sm:$0xff] }
  0x44   : > { %5353 = vmatmul.mubr.msk.f32.gmra.mxu1 %vm268_vm1, %v6075_v57  ;;  %5405 = vmatprep.mubr.msk.f32.mxu0 %vm268_vm1, %v6084_v60  ;;  %v6201_v60 = vld [vmem:[%s5806_s23 + $0x109] sm:$0xff]  ;;  %7372 = vst [vmem:[#allocation24_spill] sm:$0xff] %v6204_v58 }
  0x45   : > { %5355 = vmatprep.mubr.msk.f32.mxu1 %vm268_vm1, %v6081_v59 }
  0x47   : > { %5406 = vmatmul.mubr.msk.f32.gmra.mxu0 %vm268_vm1, %v6098_v62  ;;  %v6184_v62 = vld [vmem:[%s5806_s23 + $0xf2] sm:$0xff] }
  0x48   : > { %5356 = vmatmul.mubr.msk.f32.gmra.mxu1 %vm268_vm1, %v6095_v61  ;;  %5408 = vmatprep.mubr.msk.f32.mxu0 %vm268_vm1, %v6104_v0  ;;  %v6181_v0 = vld [vmem:[%s5806_s23 + $0xf1] sm:$0xff]  ;;  %7370 = vst [vmem:[#allocation22_spill] sm:$0xff] %v6184_v62 }
  0x49   : > { %5358 = vmatprep.mubr.msk.f32.mxu1 %vm268_vm1, %v6101_v63 }
  0x4b   : > { %5409 = vmatmul.mubr.msk.f32.gmra.mxu0 %vm268_vm1, %v6118_v2  ;;  %v6164_v2 = vld [vmem:[%s5806_s23 + $0xda] sm:$0xff] }
  0x4c   : > { %5359 = vmatmul.mubr.msk.f32.gmra.mxu1 %vm268_vm1, %v6115_v1  ;;  %5411 = vmatprep.mubr.msk.f32.mxu0 %vm268_vm1, %v6124_v5  ;;  %v6161_v5 = vld [vmem:[%s5806_s23 + $0xd9] sm:$0xff]  ;;  %7368 = vst [vmem:[#allocation20_spill] sm:$0xff] %v6164_v2 }
  0x4d   : > { %5361 = vmatprep.mubr.msk.f32.mxu1 %vm268_vm1, %v6121_v3 }
  0x4f   : > { %5412 = vmatmul.mubr.msk.f32.gmra.mxu0 %vm268_vm1, %v6138_v10  ;;  %v6178_v10 = vld [vmem:[%s5806_s23 + $0xe2] sm:$0xff] }
  0x50   : > { %5362 = vmatmul.mubr.msk.f32.gmra.mxu1 %vm268_vm1, %v6135_v9  ;;  %5414 = vmatprep.mubr.msk.f32.mxu0 %vm268_vm1, %v6144_v38  ;;  %v6175_v38 = vld [vmem:[%s5806_s23 + $0xe1] sm:$0xff]  ;;  %7369 = vst [vmem:[#allocation21_spill] sm:$0xff] %v6178_v10 }
  0x51   : > { %5364 = vmatprep.mubr.msk.f32.mxu1 %vm268_vm1, %v6141_v37 }
  0x53   : > { %5415 = vmatmul.mubr.msk.f32.gmra.mxu0 %vm268_vm1, %v6158_v40  ;;  %v6198_v40 = vld [vmem:[%s5806_s23 + $0xfa] sm:$0xff] }
  0x54   : > { %5365 = vmatmul.mubr.msk.f32.gmra.mxu1 %vm268_vm1, %v6155_v39  ;;  %5417 = vmatprep.mubr.msk.f32.mxu0 %vm268_vm1, %v6164_v2  ;;  %v6195_v2 = vld [vmem:[%s5806_s23 + $0xf9] sm:$0xff]  ;;  %7371 = vst [vmem:[#allocation23_spill] sm:$0xff] %v6198_v40 }
  0x55   : > { %5367 = vmatprep.mubr.msk.f32.mxu1 %vm268_vm1, %v6161_v5 }
  0x57   : > { %5418 = vmatmul.mubr.msk.f32.gmra.mxu0 %vm268_vm1, %v6178_v10  ;;  %v6218_v10 = vld [vmem:[%s5806_s23 + $0x112] sm:$0xff] }
  0x58   : > { %5368 = vmatmul.mubr.msk.f32.gmra.mxu1 %vm268_vm1, %v6175_v38  ;;  %5420 = vmatprep.mubr.msk.f32.mxu0 %vm268_vm1, %v6184_v62  ;;  %v6215_v62 = vld [vmem:[%s5806_s23 + $0x111] sm:$0xff]  ;;  %7373 = vst [vmem:[#allocation25_spill] sm:$0xff] %v6218_v10 }
  0x59   : > { %5370 = vmatprep.mubr.msk.f32.mxu1 %vm268_vm1, %v6181_v0 }
  0x5b   : > { %5421 = vmatmul.mubr.msk.f32.gmra.mxu0 %vm268_vm1, %v6198_v40  ;;  %v6238_v40 = vld [vmem:[%s5806_s23 + $0x12a] sm:$0xff] }
  0x5c   : > { %5371 = vmatmul.mubr.msk.f32.gmra.mxu1 %vm268_vm1, %v6195_v2  ;;  %5423 = vmatprep.mubr.msk.f32.mxu0 %vm268_vm1, %v6204_v58  ;;  %v6235_v58 = vld [vmem:[%s5806_s23 + $0x129] sm:$0xff]  ;;  %7377 = vst [vmem:[#allocation29_spill] sm:$0xff] %v6238_v40 }
  0x5d   : > { %5373 = vmatprep.mubr.msk.f32.mxu1 %vm268_vm1, %v6201_v60  ;;  %7376 = vst [vmem:[#allocation28_spill] sm:$0xff] %v6235_v58 }
  0x5f   : > { %5424 = vmatmul.mubr.msk.f32.gmra.mxu0 %vm268_vm1, %v6218_v10  ;;  %v6258_v10 = vld [vmem:[%s5806_s23 + $0x142] sm:$0xff] }
  0x60   : > { %5374 = vmatmul.mubr.msk.f32.gmra.mxu1 %vm268_vm1, %v6215_v62  ;;  %5426 = vmatprep.mubr.msk.f32.mxu0 %vm268_vm1, %v6224_v54  ;;  %v6255_v54 = vld [vmem:[%s5806_s23 + $0x141] sm:$0xff]  ;;  %7381 = vst [vmem:[#allocation33_spill] sm:$0xff] %v6258_v10 }
  0x61   : > { %5376 = vmatprep.mubr.msk.f32.mxu1 %vm268_vm1, %v6221_v56  ;;  %7380 = vst [vmem:[#allocation32_spill] sm:$0xff] %v6255_v54 }
  0x63   : > { %5427 = vmatmul.mubr.msk.f32.gmra.mxu0 %vm268_vm1, %v6238_v40  ;;  %v6278_v40 = vld [vmem:[%s5806_s23 + $0x15a] sm:$0xff] }
  0x64   : > { %5377 = vmatmul.mubr.msk.f32.gmra.mxu1 %vm268_vm1, %v6235_v58  ;;  %5429 = vmatprep.mubr.msk.f32.mxu0 %vm268_vm1, %v6244_v50  ;;  %v6275_v50 = vld [vmem:[%s5806_s23 + $0x159] sm:$0xff]  ;;  %7385 = vst [vmem:[#allocation37_spill] sm:$0xff] %v6278_v40 }
  0x65   : > { %5379 = vmatprep.mubr.msk.f32.mxu1 %vm268_vm1, %v6241_v52  ;;  %7384 = vst [vmem:[#allocation36_spill] sm:$0xff] %v6275_v50 }
  0x67   : > { %5430 = vmatmul.mubr.msk.f32.gmra.mxu0 %vm268_vm1, %v6258_v10  ;;  %v6298_v10 = vld [vmem:[%s5806_s23 + $0x172] sm:$0xff] }
  0x68   : > { %5380 = vmatmul.mubr.msk.f32.gmra.mxu1 %vm268_vm1, %v6255_v54  ;;  %5432 = vmatprep.mubr.msk.f32.mxu0 %vm268_vm1, %v6264_v46  ;;  %v6295_v46 = vld [vmem:[%s5806_s23 + $0x171] sm:$0xff]  ;;  %7387 = vst [vmem:[#allocation39_spill] sm:$0xff] %v6298_v10 }
  0x69   : > { %5382 = vmatprep.mubr.msk.f32.mxu1 %vm268_vm1, %v6261_v48 }
  0x6b   : > { %5433 = vmatmul.mubr.msk.f32.gmra.mxu0 %vm268_vm1, %v6278_v40 }
  0x6c   : > { %5383 = vmatmul.mubr.msk.f32.gmra.mxu1 %vm268_vm1, %v6275_v50  ;;  %5435 = vmatprep.mubr.msk.f32.mxu0 %vm268_vm1, %v6284_v36  ;;  %v6315_v36 = vld [vmem:[%s7281_s1 + $0x1c] sm:$0xf] }
  0x6d   : > { %5385 = vmatprep.mubr.msk.f32.mxu1 %vm268_vm1, %v6281_v42 }
  0x6f   : > { %5436 = vmatmul.mubr.msk.f32.gmra.mxu0 %vm268_vm1, %v6298_v10  ;;  %v6320_v10 = vld [vmem:[%s7281_s1 + $0x20] sm:$0xf] }
  0x70   : > { %5386 = vmatmul.mubr.msk.f32.gmra.mxu1 %vm268_vm1, %v6295_v46  ;;  %5490 = vmatprep.mubr.msk.f32.mxu0 %vm268_vm1, %v5985_v41  ;;  %v7389_v41 = vld [vmem:[#allocation3_spill] sm:$0xff] }
  0x71   : > { %5440 = vmatprep.mubr.msk.f32.mxu1 %vm268_vm1, %v5820_v7  ;;  %v6439_v7 = vld [vmem:[%s5806_s23 + $0x180] sm:$0xff] }
  0x73   : > { %5491 = vmatmul.mubr.msk.f32.vlgmr.msra.gmra.mxu0 %vm268_vm1, %v6007_v45  ;;  %v7392_v45 = vld [vmem:[#allocation5_spill] sm:$0xff] }
  0x74   : > { %5441 = vmatmul.mubr.msk.f32.vlgmr.msra.gmra.mxu1 %vm268_vm1, %v5841_v11  ;;  %5589 = vmatpush3.msk.msra.mxu0 %vm365_vm0, %v6000_v44  ;;  %v6442_v11 = vld [vmem:[%s5806_s23 + $0x181] sm:$0xff]  ;;  %v6456_v44 = vld [vmem:[%s5806_s23 + $0x189] sm:$0xff] }
  0x75   : > { %5539 = vmatpush3.msk.msra.mxu1 %vm365_vm0, %v5995_v43  ;;  %5443 = vmatprep.mubr.msk.f32.mxu1 %vm268_vm1, %v5851_v13  ;;  %7388 = vst [vmem:[#allocation40_spill] sm:$0xff] %v6442_v11  ;;  %v6453_v43 = vld [vmem:[%s5806_s23 + $0x188] sm:$0xff]  ;;  %7390 = vst [vmem:[#allocation3_spill] sm:$0xff] %v6456_v44 }
  0x76   : > { %5493 = vmatprep.mubr.msk.f32.mxu0 %vm268_vm1, %v6017_v47  ;;  %5638 = vmatprep.subr.msk.mxu1 %vm365_vm0, %v6315_v36 }
  0x77   : > { %5688 = vmatprep.subr.msk.mxu0 %vm365_vm0, %v6320_v10  ;;  %5494 = vmatmul.mubr.msk.f32.gmra.mxu0 %vm268_vm1, %v6035_v49 }
  0x78   : > { %5444 = vmatmul.mubr.msk.f32.gmra.mxu1 %vm268_vm1, %v5869_v15  ;;  %5496 = vmatprep.mubr.msk.f32.mxu0 %vm268_vm1, %v6041_v51 }
  0x79   : > { %5446 = vmatprep.mubr.msk.f32.mxu1 %vm268_vm1, %v5875_v17 }
  0x7b   : > { %5497 = vmatmul.mubr.msk.f32.gmra.mxu0 %vm268_vm1, %v6055_v53 }
  0x7c   : > { %5447 = vmatmul.mubr.msk.f32.gmra.mxu1 %vm268_vm1, %v5889_v19  ;;  %5499 = vmatprep.mubr.msk.f32.mxu0 %vm268_vm1, %v6061_v55 }
  0x7d   : > { %5449 = vmatprep.mubr.msk.f32.mxu1 %vm268_vm1, %v5895_v21 }
  0x7f   : > { %5500 = vmatmul.mubr.msk.f32.gmra.mxu0 %vm268_vm1, %v6075_v57 }
  0x80   : > { %5450 = vmatmul.mubr.msk.f32.gmra.mxu1 %vm268_vm1, %v5909_v23  ;;  %5502 = vmatprep.mubr.msk.f32.mxu0 %vm268_vm1, %v6081_v59 }
  0x81   : > { %5452 = vmatprep.mubr.msk.f32.mxu1 %vm268_vm1, %v5915_v25 }
  0x83   : > { %5503 = vmatmul.mubr.msk.f32.gmra.mxu0 %vm268_vm1, %v6095_v61 }
  0x84   : > { %5453 = vmatmul.mubr.msk.f32.gmra.mxu1 %vm268_vm1, %v5929_v27  ;;  %5505 = vmatprep.mubr.msk.f32.mxu0 %vm268_vm1, %v6101_v63 }
  0x85   : > { %5455 = vmatprep.mubr.msk.f32.mxu1 %vm268_vm1, %v5935_v29 }
  0x87   : > { %5506 = vmatmul.mubr.msk.f32.gmra.mxu0 %vm268_vm1, %v6115_v1 }
  0x88   : > { %5456 = vmatmul.mubr.msk.f32.gmra.mxu1 %vm268_vm1, %v5949_v31  ;;  %5508 = vmatprep.mubr.msk.f32.mxu0 %vm268_vm1, %v6121_v3 }
  0x89   : > { %5458 = vmatprep.mubr.msk.f32.mxu1 %vm268_vm1, %v5955_v33 }
  0x8b   : > { %5509 = vmatmul.mubr.msk.f32.gmra.mxu0 %vm268_vm1, %v6135_v9 }
  0x8c   : > { %5459 = vmatmul.mubr.msk.f32.gmra.mxu1 %vm268_vm1, %v5969_v35  ;;  %5511 = vmatprep.mubr.msk.f32.mxu0 %vm268_vm1, %v6141_v37 }
  0x8d   : > { %5461 = vmatprep.mubr.msk.f32.mxu1 %vm268_vm1, %v5810_v4 }
  0x8f   : > { %5512 = vmatmul.mubr.msk.f32.gmra.mxu0 %vm268_vm1, %v6155_v39 }
  0x90   : > { %5462 = vmatmul.mubr.msk.f32.gmra.mxu1 %vm268_vm1, %v5817_v6  ;;  %5514 = vmatprep.mubr.msk.f32.mxu0 %vm268_vm1, %v6161_v5 }
  0x91   : > { %5464 = vmatprep.mubr.msk.f32.mxu1 %vm268_vm1, %v5823_v8 }
  0x93   : > { %5515 = vmatmul.mubr.msk.f32.gmra.mxu0 %vm268_vm1, %v6175_v38 }
  0x94   : > { %5465 = vmatmul.mubr.msk.f32.gmra.mxu1 %vm268_vm1, %v5844_v12  ;;  %5517 = vmatprep.mubr.msk.f32.mxu0 %vm268_vm1, %v6181_v0 }
  0x95   : > { %5467 = vmatprep.mubr.msk.f32.mxu1 %vm268_vm1, %v5854_v14 }
  0x97   : > { %5518 = vmatmul.mubr.msk.f32.gmra.mxu0 %vm268_vm1, %v6195_v2 }
  0x98   : > { %5468 = vmatmul.mubr.msk.f32.gmra.mxu1 %vm268_vm1, %v5872_v16  ;;  %5520 = vmatprep.mubr.msk.f32.mxu0 %vm268_vm1, %v6201_v60 }
  0x99   : > { %5470 = vmatprep.mubr.msk.f32.mxu1 %vm268_vm1, %v5878_v18 }
  0x9b   : > { %5521 = vmatmul.mubr.msk.f32.gmra.mxu0 %vm268_vm1, %v6215_v62 }
  0x9c   : > { %5471 = vmatmul.mubr.msk.f32.gmra.mxu1 %vm268_vm1, %v5892_v20  ;;  %5523 = vmatprep.mubr.msk.f32.mxu0 %vm268_vm1, %v6221_v56 }
  0x9d   : > { %5473 = vmatprep.mubr.msk.f32.mxu1 %vm268_vm1, %v5898_v22 }
  0x9f   : > { %5524 = vmatmul.mubr.msk.f32.gmra.mxu0 %vm268_vm1, %v6235_v58 }
  0xa0   : > { %5474 = vmatmul.mubr.msk.f32.gmra.mxu1 %vm268_vm1, %v5912_v24  ;;  %5526 = vmatprep.mubr.msk.f32.mxu0 %vm268_vm1, %v6241_v52  ;;  %v7415_v52 = vld [vmem:[#allocation25_spill] sm:$0xff] }
  0xa1   : > { %5476 = vmatprep.mubr.msk.f32.mxu1 %vm268_vm1, %v5918_v26 }
  0xa3   : > { %5527 = vmatmul.mubr.msk.f32.gmra.mxu0 %vm268_vm1, %v6255_v54 }
  0xa4   : > { %5477 = vmatmul.mubr.msk.f32.gmra.mxu1 %vm268_vm1, %v5932_v28  ;;  %5529 = vmatprep.mubr.msk.f32.mxu0 %vm268_vm1, %v6261_v48 }
  0xa5   : > { %5479 = vmatprep.mubr.msk.f32.mxu1 %vm268_vm1, %v5938_v30 }
  0xa7   : > { %5530 = vmatmul.mubr.msk.f32.gmra.mxu0 %vm268_vm1, %v6275_v50 }
  0xa8   : > { %5480 = vmatmul.mubr.msk.f32.gmra.mxu1 %vm268_vm1, %v5952_v32  ;;  %5532 = vmatprep.mubr.msk.f32.mxu0 %vm268_vm1, %v6281_v42  ;;  %v7391_v42 = vld [vmem:[#allocation4_spill] sm:$0xff] }
  0xa9   : > { %5482 = vmatprep.mubr.msk.f32.mxu1 %vm268_vm1, %v5958_v34 }
  0xab   : > { %5533 = vmatmul.mubr.msk.f32.gmra.mxu0 %vm268_vm1, %v6295_v46  ;;  %v7393_v46 = vld [vmem:[#allocation6_spill] sm:$0xff] }
  0xac   : > { %5483 = vmatmul.mubr.msk.f32.gmra.mxu1 %vm268_vm1, %v7389_v41  ;;  %5535 = vmatprep.mubr.msk.f32.mxu0 %vm268_vm1, %v6442_v11  ;;  %v7411_v11 = vld [vmem:[#allocation23_spill] sm:$0xff] }
  0xad   : > { %5485 = vmatprep.mubr.msk.f32.mxu1 %vm268_vm1, %v6439_v7 }
  0xaf   : > { %5536 = vmatmul.mubr.msk.f32.gmra.mxu0 %vm268_vm1, %v6456_v44 }
  0xb0   : > { %5486 = vmatmul.mubr.msk.f32.gmra.mxu1 %vm268_vm1, %v6453_v43  ;;  %5590 = vmatprep.mubr.msk.f32.mxu0 %vm268_vm1, %v5851_v13  ;;  %v7395_v13 = vld [vmem:[#allocation8_spill] sm:$0xff] }
  0xb1   : > { %5540 = vmatprep.mubr.msk.f32.mxu1 %vm268_vm1, %v7391_v42  ;;  %v7394_v42 = vld [vmem:[#allocation7_spill] sm:$0xff] }
  0xb3   : > { %5591 = vmatmul.mubr.msk.f32.vlgmr.msra.gmra.mxu0 %vm268_vm1, %v5869_v15  ;;  %v7396_v15 = vld [vmem:[#allocation9_spill] sm:$0xff] }
  0xb4   : > { %5541 = vmatmul.mubr.msk.f32.vlgmr.msra.gmra.mxu1 %vm268_vm1, %v7392_v45  ;;  %5689 = vmatpush3.msk.msra.mxu0 %vm365_vm0, %v6320_v10  ;;  %v7408_v10 = vld [vmem:[#allocation21_spill] sm:$0xff] }
  0xb5   : > { %5639 = vmatpush3.msk.msra.mxu1 %vm365_vm0, %v6315_v36  ;;  %5543 = vmatprep.mubr.msk.f32.mxu1 %vm268_vm1, %v7393_v46  ;;  %v7397_v36 = vld [vmem:[#allocation10_spill] sm:$0xff] }
  0xb6   : > { %5593 = vmatprep.mubr.msk.f32.mxu0 %vm268_vm1, %v5875_v17  ;;  %v7398_v17 = vld [vmem:[#allocation11_spill] sm:$0xff] }
  0xb7   : > { %5594 = vmatmul.mubr.msk.f32.gmra.mxu0 %vm268_vm1, %v5889_v19  ;;  %v7399_v19 = vld [vmem:[#allocation12_spill] sm:$0xff] }
  0xb8   : > { %5544 = vmatmul.mubr.msk.f32.gmra.mxu1 %vm268_vm1, %v7394_v42  ;;  %5596 = vmatprep.mubr.msk.f32.mxu0 %vm268_vm1, %v5895_v21  ;;  %v7400_v21 = vld [vmem:[#allocation13_spill] sm:$0xff] }
  0xb9   : > { %5546 = vmatprep.mubr.msk.f32.mxu1 %vm268_vm1, %v7395_v13 }
  0xbb   : > { %5597 = vmatmul.mubr.msk.f32.gmra.mxu0 %vm268_vm1, %v5909_v23  ;;  %v7401_v23 = vld [vmem:[#allocation14_spill] sm:$0xff] }
  0xbc   : > { %5547 = vmatmul.mubr.msk.f32.gmra.mxu1 %vm268_vm1, %v7396_v15  ;;  %5599 = vmatprep.mubr.msk.f32.mxu0 %vm268_vm1, %v5915_v25  ;;  %v7402_v25 = vld [vmem:[#allocation15_spill] sm:$0xff] }
  0xbd   : > { %5549 = vmatprep.mubr.msk.f32.mxu1 %vm268_vm1, %v7397_v36 }
  0xbf   : > { %5600 = vmatmul.mubr.msk.f32.gmra.mxu0 %vm268_vm1, %v5929_v27  ;;  %v7403_v27 = vld [vmem:[#allocation16_spill] sm:$0xff] }
  0xc0   : > { %5550 = vmatmul.mubr.msk.f32.gmra.mxu1 %vm268_vm1, %v7398_v17  ;;  %5602 = vmatprep.mubr.msk.f32.mxu0 %vm268_vm1, %v5935_v29  ;;  %v7404_v29 = vld [vmem:[#allocation17_spill] sm:$0xff] }
  0xc1   : > { %5552 = vmatprep.mubr.msk.f32.mxu1 %vm268_vm1, %v7399_v19 }
  0xc3   : > { %5603 = vmatmul.mubr.msk.f32.gmra.mxu0 %vm268_vm1, %v5949_v31  ;;  %v7405_v31 = vld [vmem:[#allocation18_spill] sm:$0xff] }
  0xc4   : > { %5553 = vmatmul.mubr.msk.f32.gmra.mxu1 %vm268_vm1, %v7400_v21  ;;  %5605 = vmatprep.mubr.msk.f32.mxu0 %vm268_vm1, %v5955_v33  ;;  %v7406_v33 = vld [vmem:[#allocation19_spill] sm:$0xff] }
  0xc5   : > { %5555 = vmatprep.mubr.msk.f32.mxu1 %vm268_vm1, %v7401_v23 }
  0xc7   : > { %5606 = vmatmul.mubr.msk.f32.gmra.mxu0 %vm268_vm1, %v5969_v35  ;;  %v7407_v35 = vld [vmem:[#allocation20_spill] sm:$0xff] }
  0xc8   : > { %5556 = vmatmul.mubr.msk.f32.gmra.mxu1 %vm268_vm1, %v7402_v25  ;;  %5608 = vmatprep.mubr.msk.f32.mxu0 %vm268_vm1, %v5810_v4 }
  0xc9   : > { %5558 = vmatprep.mubr.msk.f32.mxu1 %vm268_vm1, %v7403_v27 }
  0xcb   : > { %5609 = vmatmul.mubr.msk.f32.gmra.mxu0 %vm268_vm1, %v5817_v6 }
  0xcc   : > { %5559 = vmatmul.mubr.msk.f32.gmra.mxu1 %vm268_vm1, %v7404_v29  ;;  %5611 = vmatprep.mubr.msk.f32.mxu0 %vm268_vm1, %v5823_v8  ;;  %v7409_v8 = vld [vmem:[#allocation22_spill] sm:$0xff] }
  0xcd   : > { %5561 = vmatprep.mubr.msk.f32.mxu1 %vm268_vm1, %v7405_v31 }
  0xcf   : > { %5612 = vmatmul.mubr.msk.f32.gmra.mxu0 %vm268_vm1, %v5844_v12 }
  0xd0   : > { %5562 = vmatmul.mubr.msk.f32.gmra.mxu1 %vm268_vm1, %v7406_v33  ;;  %5614 = vmatprep.mubr.msk.f32.mxu0 %vm268_vm1, %v5854_v14 }
  0xd1   : > { %5564 = vmatprep.mubr.msk.f32.mxu1 %vm268_vm1, %v7407_v35 }
  0xd3   : > { %v6534_v4 = vpop.f32.mrf.mxu0  ;;  %5615 = vmatmul.mubr.msk.f32.gmra.mxu0 %vm268_vm1, %v5872_v16  ;;  %v7412_v16 = vld [vmem:[#allocation24_spill] sm:$0xff] }
  0xd4   : > { %v6536_v6 = vpop.f32.mrf.mxu1  ;;  %5565 = vmatmul.mubr.msk.f32.gmra.mxu1 %vm268_vm1, %v7408_v10  ;;  %5617 = vmatprep.mubr.msk.f32.mxu0 %vm268_vm1, %v5878_v18 }
  0xd5   : > { %5567 = vmatprep.mubr.msk.f32.mxu1 %vm268_vm1, %v7409_v8  ;;  %v6546_v12 = vpop.f32.mrf.mxu0 }
  0xd6   : > { %v6548_v45 = vpop.f32.mrf.mxu1 }
  0xd7   : > { %v6550_v14 = vpop.f32.mrf.mxu0  ;;  %5618 = vmatmul.mubr.msk.f32.gmra.mxu0 %vm268_vm1, %v5892_v20  ;;  %v7416_v20 = vld [vmem:[#allocation27_spill] sm:$0xff] }
  0xd8   : > { %v6552_v44 = vpop.f32.mrf.mxu1  ;;  %5568 = vmatmul.mubr.msk.f32.gmra.mxu1 %vm268_vm1, %v7411_v11  ;;  %5620 = vmatprep.mubr.msk.f32.mxu0 %vm268_vm1, %v5898_v22 }
  0xd9   : > { %7410 = vst [vmem:[#allocation4_spill] sm:$0xff] %v6552_v44  ;;  %5570 = vmatprep.mubr.msk.f32.mxu1 %vm268_vm1, %v7412_v16  ;;  %v6562_v18 = vpop.f32.mrf.mxu0  ;;  %v7423_v44 = vld [vmem:[#allocation33_spill] sm:$0xff] }
  0xda   : > { %v6564_v50 = vpop.f32.mrf.mxu1 }
  0xdb   : > { %7413 = vst [vmem:[#allocation5_spill] sm:$0xff] %v6564_v50  ;;  %v6566_v48 = vpop.f32.mrf.mxu0  ;;  %5621 = vmatmul.mubr.msk.f32.gmra.mxu0 %vm268_vm1, %v5912_v24  ;;  %v7420_v24 = vld [vmem:[#allocation31_spill] sm:$0xff] }
  0xdc   : > { %v6568_v54 = vpop.f32.mrf.mxu1  ;;  %5571 = vmatmul.mubr.msk.f32.gmra.mxu1 %vm268_vm1, %v7415_v52  ;;  %5623 = vmatprep.mubr.msk.f32.mxu0 %vm268_vm1, %v5918_v26 }
  0xdd   : > { %7414 = vst [vmem:[#allocation6_spill] sm:$0xff] %v6568_v54  ;;  %5573 = vmatprep.mubr.msk.f32.mxu1 %vm268_vm1, %v7416_v20  ;;  %v6578_v22 = vpop.f32.mrf.mxu0  ;;  %v7419_v54 = vld [vmem:[#allocation29_spill] sm:$0xff] }
  0xde   : > { %v6580_v58 = vpop.f32.mrf.mxu1 }
  0xdf   : > { %7417 = vst [vmem:[#allocation7_spill] sm:$0xff] %v6580_v58  ;;  %v6582_v50 = vpop.f32.mrf.mxu0  ;;  %5624 = vmatmul.mubr.msk.f32.gmra.mxu0 %vm268_vm1, %v5932_v28  ;;  %v7424_v28 = vld [vmem:[#allocation35_spill] sm:$0xff] }
  0xe0   : > { %v6584_v56 = vpop.f32.mrf.mxu1  ;;  %5574 = vmatmul.mubr.msk.f32.gmra.mxu1 %vm268_vm1, %v7419_v54  ;;  %5626 = vmatprep.mubr.msk.f32.mxu0 %vm268_vm1, %v5938_v30 }
  0xe1   : > { %7418 = vst [vmem:[#allocation8_spill] sm:$0xff] %v6584_v56  ;;  %5576 = vmatprep.mubr.msk.f32.mxu1 %vm268_vm1, %v7420_v24  ;;  %v6594_v26 = vpop.f32.mrf.mxu0 }
  0xe2   : > { %v6596_v20 = vpop.f32.mrf.mxu1 }
  0xe3   : > { %7421 = vst [vmem:[#allocation9_spill] sm:$0xff] %v6596_v20  ;;  %v6598_v58 = vpop.f32.mrf.mxu0  ;;  %5627 = vmatmul.mubr.msk.f32.gmra.mxu0 %vm268_vm1, %v5952_v32  ;;  %v7427_v32 = vld [vmem:[#allocation38_spill] sm:$0xff] }
  0xe4   : > { %v6600_v56 = vpop.f32.mrf.mxu1  ;;  %5577 = vmatmul.mubr.msk.f32.gmra.mxu1 %vm268_vm1, %v7423_v44  ;;  %5629 = vmatprep.mubr.msk.f32.mxu0 %vm268_vm1, %v5958_v34 }
  0xe5   : > { %7422 = vst [vmem:[#allocation10_spill] sm:$0xff] %v6600_v56  ;;  %5579 = vmatprep.mubr.msk.f32.mxu1 %vm268_vm1, %v7424_v28  ;;  %v6610_v30 = vpop.f32.mrf.mxu0  ;;  %v6631_v28 = vld [vmem:[%s5806_s23 + $0x182] sm:$0xff] }
  0xe6   : > { %v6612_v20 = vpop.f32.mrf.mxu1  ;;  %7429 = vst [vmem:[#allocation14_spill] sm:$0xff] %v6631_v28 }
  0xe7   : > { %7425 = vst [vmem:[#allocation11_spill] sm:$0xff] %v6612_v20  ;;  %v6614_v24 = vpop.f32.mrf.mxu0  ;;  %5630 = vmatmul.mubr.msk.f32.gmra.mxu0 %vm268_vm1, %v7389_v41  ;;  %v4820_v41 = vld [vmem:[%s5806_s23 + $0x1a0] sm:$0xff] }
  0xe8   : > { %v6616_v56 = vpop.f32.mrf.mxu1  ;;  %5580 = vmatmul.mubr.msk.f32.gmra.mxu1 %vm268_vm1, %v6278_v40  ;;  %5632 = vmatprep.mubr.msk.f32.mxu0 %vm268_vm1, %v6439_v7  ;;  %v7431_v40 = vld [vmem:[#allocation39_spill] sm:$0xff]  ;;  %v6646_v7 = vld [vmem:[%s5806_s23 + $0x18a] sm:$0xff] }
  0xe9   : > { %7426 = vst [vmem:[#allocation12_spill] sm:$0xff] %v6616_v56  ;;  %5582 = vmatprep.mubr.msk.f32.mxu1 %vm268_vm1, %v7427_v32  ;;  %v6626_v34 = vpop.f32.mrf.mxu0  ;;  %v4819_v56 = vld [vmem:[%s5806_s23 + $0x198] sm:$0xff]  ;;  %7432 = vst [vmem:[#allocation16_spill] sm:$0xff] %v6646_v7 }
  0xea   : > { %v6628_v20 = vpop.f32.mrf.mxu1 }
  0xeb   : > { %7428 = vst [vmem:[#allocation13_spill] sm:$0xff] %v6628_v20  ;;  %v6634_v44 = vpop.f32.mrf.mxu0  ;;  %5633 = vmatmul.mubr.msk.f32.gmra.mxu0 %vm268_vm1, %v6453_v43 }
  0xec   : > { %v6636_v54 = vpop.f32.mrf.mxu1  ;;  %5583 = vmatmul.mubr.msk.f32.gmra.mxu1 %vm268_vm1, %v7431_v40  ;;  %5635 = vmatprep.mubr.msk.f32.mxu0 %vm268_vm1, %v4819_v56 }
  0xed   : > { %7430 = vst [vmem:[#allocation15_spill] sm:$0xff] %v6636_v54  ;;  %5585 = vmatprep.mubr.msk.f32.mxu1 %vm268_vm1, %v6631_v28  ;;  %v6649_v32 = vpop.f32.mrf.mxu0 }
  0xee   : > { %v6651_v20 = vpop.f32.mrf.mxu1 }
  0xef   : > { %7433 = vst [vmem:[#allocation17_spill] sm:$0xff] %v6651_v20  ;;  %v6653_v52 = vpop.f32.mrf.mxu0  ;;  %5636 = vmatmul.mubr.msk.f32.gmra.mxu0 %vm268_vm1, %v4820_v41 }
  0xf0   : > { %v6655_v54 = vpop.f32.mrf.mxu1  ;;  %5586 = vmatmul.mubr.msk.f32.gmra.mxu1 %vm268_vm1, %v6646_v7  ;;  %5690 = vmatprep.mubr.msk.f32.mxu0 %vm268_vm1, %v7393_v46 }
  0xf1   : > { %7434 = vst [vmem:[#allocation18_spill] sm:$0xff] %v6655_v54  ;;  %5640 = vmatprep.mubr.msk.f32.mxu1 %vm268_vm1, %v6017_v47  ;;  %v6664_v56 = vpop.f32.mrf.mxu0 }
  0xf2   : > { %v6666_v40 = vpop.f32.mrf.mxu1 }
  0xf3   : > { %7435 = vst [vmem:[#allocation19_spill] sm:$0xff] %v6666_v40  ;;  %v5392_v20 = vpop.f32.mrf.mxu0  ;;  %5691 = vmatmul.mubr.msk.f32.vlgmr.msra.gmra.mxu0 %vm268_vm1, %v7394_v42 }
  0xf4   : > { %v5342_v43 = vpop.f32.mrf.mxu1  ;;  %5641 = vmatmul.mubr.msk.f32.vlgmr.msra.gmra.mxu1 %vm268_vm1, %v6035_v49  ;;  %5693 = vmatprep.mubr.msk.f32.mxu0 %vm268_vm1, %v7395_v13 }
  0xf5   : > { %v1049_v41 = vadd.f32 %v5342_v43, %v6534_v4  ;;  %5643 = vmatprep.mubr.msk.f32.mxu1 %vm268_vm1, %v6041_v51  ;;  %v1343_v46 = vpop.f32.mrf.mxu0 }
  0xf6   : > { %v889_v47 = vpop.f32.mrf.mxu1 }
  0xf7   : > { %v6677_v54 = vadd.f32 %v5392_v20, %v1049_v41  ;;  %v1048_v40 = vadd.f32 %v889_v47, %v6546_v12  ;;  %v5395_v28 = vpop.f32.mrf.mxu0  ;;  %5694 = vmatmul.mubr.msk.f32.gmra.mxu0 %vm268_vm1, %v7396_v15 }
  0xf8   : > { %v5345_v7 = vpop.f32.mrf.mxu1  ;;  %5644 = vmatmul.mubr.msk.f32.gmra.mxu1 %vm268_vm1, %v6055_v53  ;;  %5696 = vmatprep.mubr.msk.f32.mxu0 %vm268_vm1, %v7397_v36 }
  0xf9   : > { %v6684_v49 = vadd.f32 %v1343_v46, %v1048_v40  ;;  %v1051_v51 = vadd.f32 %v5345_v7, %v6550_v14  ;;  %5646 = vmatprep.mubr.msk.f32.mxu1 %vm268_vm1, %v6061_v55  ;;  %v1353_v13 = vpop.f32.mrf.mxu0 }
  0xfa   : > { %v899_v42 = vpop.f32.mrf.mxu1 }
  0xfb   : > { %v6691_v4 = vadd.f32 %v5395_v28, %v1051_v51  ;;  %v1050_v12 = vadd.f32 %v899_v42, %v6562_v18  ;;  %v5398_v20 = vpop.f32.mrf.mxu0  ;;  %5697 = vmatmul.mubr.msk.f32.gmra.mxu0 %vm268_vm1, %v7398_v17 }
  0xfc   : > { %v5348_v53 = vpop.f32.mrf.mxu1  ;;  %5647 = vmatmul.mubr.msk.f32.gmra.mxu1 %vm268_vm1, %v6075_v57  ;;  %5699 = vmatprep.mubr.msk.f32.mxu0 %vm268_vm1, %v7399_v19 }
  0xfd   : > { %v6698_v15 = vadd.f32 %v1353_v13, %v1050_v12  ;;  %v1053_v55 = vadd.f32 %v5348_v53, %v6566_v48  ;;  %5649 = vmatprep.mubr.msk.f32.mxu1 %vm268_vm1, %v6081_v59  ;;  %v1363_v14 = vpop.f32.mrf.mxu0 }
  0xfe   : > { %v909_v36 = vpop.f32.mrf.mxu1 }
  0xff   : > { %v6705_v18 = vadd.f32 %v5398_v20, %v1053_v55  ;;  %v1052_v28 = vadd.f32 %v909_v36, %v6578_v22  ;;  %v5401_v7 = vpop.f32.mrf.mxu0  ;;  %5700 = vmatmul.mubr.msk.f32.gmra.mxu0 %vm268_vm1, %v7400_v21 }
 0x100   : > { %v5351_v57 = vpop.f32.mrf.mxu1  ;;  %5650 = vmatmul.mubr.msk.f32.gmra.mxu1 %vm268_vm1, %v6095_v61  ;;  %5702 = vmatprep.mubr.msk.f32.mxu0 %vm268_vm1, %v7401_v23 }
 0x101   : > { %v6712_v48 = vadd.f32 %v1363_v14, %v1052_v28  ;;  %v1055_v59 = vadd.f32 %v5351_v57, %v6582_v50  ;;  %5652 = vmatprep.mubr.msk.f32.mxu1 %vm268_vm1, %v6101_v63  ;;  %v1373_v19 = vpop.f32.mrf.mxu0  ;;  %v7438_v14 = vld [vmem:[#allocation26_spill] sm:$0xff] }
 0x102   : > { %v919_v17 = vpop.f32.mrf.mxu1 }
 0x103   : > { %v6719_v22 = vadd.f32 %v5401_v7, %v1055_v59  ;;  %v1054_v40 = vadd.f32 %v919_v17, %v6594_v26  ;;  %v5404_v43 = vpop.f32.mrf.mxu0  ;;  %5703 = vmatmul.mubr.msk.f32.gmra.mxu0 %vm268_vm1, %v7402_v25  ;;  %v7440_v7 = vld [vmem:[#allocation5_spill] sm:$0xff] }
 0x104   : > { %v5354_v61 = vpop.f32.mrf.mxu1  ;;  %5653 = vmatmul.mubr.msk.f32.gmra.mxu1 %vm268_vm1, %v6115_v1  ;;  %5705 = vmatprep.mubr.msk.f32.mxu0 %vm268_vm1, %v7403_v27 }
 0x105   : > { %v6726_v50 = vadd.f32 %v1373_v19, %v1054_v40  ;;  %v1057_v63 = vadd.f32 %v5354_v61, %v6598_v58  ;;  %5655 = vmatprep.mubr.msk.f32.mxu1 %vm268_vm1, %v6121_v3  ;;  %v1383_v23 = vpop.f32.mrf.mxu0  ;;  %v7441_v19 = vld [vmem:[#allocation28_spill] sm:$0xff]  ;;  %v7442_v40 = vld [vmem:[#allocation29_spill] sm:$0xff] }
 0x106   : > { %v929_v21 = vpop.f32.mrf.mxu1 }
 0x107   : > { %v6733_v26 = vadd.f32 %v5404_v43, %v1057_v63  ;;  %v1056_v41 = vadd.f32 %v929_v21, %v6610_v30  ;;  %v5407_v47 = vpop.f32.mrf.mxu0  ;;  %5706 = vmatmul.mubr.msk.f32.gmra.mxu0 %vm268_vm1, %v7404_v29  ;;  %v7443_v43 = vld [vmem:[#allocation6_spill] sm:$0xff] }
 0x108   : > { %v5357_v1 = vpop.f32.mrf.mxu1  ;;  %5656 = vmatmul.mubr.msk.f32.gmra.mxu1 %vm268_vm1, %v6135_v9  ;;  %5708 = vmatprep.mubr.msk.f32.mxu0 %vm268_vm1, %v7405_v31  ;;  %v7444_v21 = vld [vmem:[#allocation30_spill] sm:$0xff] }
 0x109   : > { %v6740_v58 = vadd.f32 %v1383_v23, %v1056_v41  ;;  %v1059_v3 = vadd.f32 %v5357_v1, %v6614_v24  ;;  %5658 = vmatprep.mubr.msk.f32.mxu1 %vm268_vm1, %v6141_v37  ;;  %v1393_v27 = vpop.f32.mrf.mxu0  ;;  %v7445_v23 = vld [vmem:[#allocation31_spill] sm:$0xff] }
 0x10a   : > { %v939_v25 = vpop.f32.mrf.mxu1 }
 0x10b   : > { %v6747_v30 = vadd.f32 %v5407_v47, %v1059_v3  ;;  %v1058_v46 = vadd.f32 %v939_v25, %v6626_v34  ;;  %v5410_v51 = vpop.f32.mrf.mxu0  ;;  %5709 = vmatmul.mubr.msk.f32.gmra.mxu0 %vm268_vm1, %v7406_v33  ;;  %v7446_v3 = vld [vmem:[#allocation7_spill] sm:$0xff] }
 0x10c   : > { %v5360_v9 = vpop.f32.mrf.mxu1  ;;  %5659 = vmatmul.mubr.msk.f32.gmra.mxu1 %vm268_vm1, %v6155_v39  ;;  %5711 = vmatprep.mubr.msk.f32.mxu0 %vm268_vm1, %v7407_v35 }
 0x10d   : > { %v6754_v29 = vadd.f32 %v1393_v27, %v1058_v46  ;;  %v1061_v37 = vadd.f32 %v5360_v9, %v6634_v44  ;;  %5661 = vmatprep.mubr.msk.f32.mxu1 %vm268_vm1, %v6161_v5  ;;  %v1403_v24 = vpop.f32.mrf.mxu0  ;;  %v7447_v9 = vld [vmem:[#allocation32_spill] sm:$0xff] }
 0x10e   : > { %v949_v31 = vpop.f32.mrf.mxu1 }
 0x10f   : > { %v6761_v34 = vadd.f32 %v5410_v51, %v1061_v37  ;;  %v1060_v42 = vadd.f32 %v949_v31, %v6649_v32  ;;  %v5413_v13 = vpop.f32.mrf.mxu0  ;;  %5712 = vmatmul.mubr.msk.f32.gmra.mxu0 %vm268_vm1, %v7408_v10  ;;  %v7448_v51 = vld [vmem:[#allocation33_spill] sm:$0xff]  ;;  %v7449_v31 = vld [vmem:[#allocation8_spill] sm:$0xff] }
 0x110   : > { %v5363_v39 = vpop.f32.mrf.mxu1  ;;  %5662 = vmatmul.mubr.msk.f32.gmra.mxu1 %vm268_vm1, %v6175_v38  ;;  %5714 = vmatprep.mubr.msk.f32.mxu0 %vm268_vm1, %v7409_v8 }
 0x111   : > { %v6768_v44 = vadd.f32 %v1403_v24, %v1060_v42  ;;  %v1063_v5 = vadd.f32 %v5363_v39, %v6653_v52  ;;  %5664 = vmatprep.mubr.msk.f32.mxu1 %vm268_vm1, %v6181_v0  ;;  %v1413_v35 = vpop.f32.mrf.mxu0  ;;  %v7450_v42 = vld [vmem:[#allocation34_spill] sm:$0xff]  ;;  %v7451_v39 = vld [vmem:[#allocation35_spill] sm:$0xff] }
 0x112   : > { %v959_v33 = vpop.f32.mrf.mxu1 }
 0x113   : > { %v6775_v32 = vadd.f32 %v5413_v13, %v1063_v5  ;;  %v1062_v12 = vadd.f32 %v959_v33, %v6664_v56  ;;  %v5416_v53 = vpop.f32.mrf.mxu0  ;;  %5715 = vmatmul.mubr.msk.f32.gmra.mxu0 %vm268_vm1, %v7411_v11  ;;  %v7436_v11 = vld [vmem:[#allocation25_spill] sm:$0xff] }
 0x114   : > { %v5366_v38 = vpop.f32.mrf.mxu1  ;;  %5665 = vmatmul.mubr.msk.f32.gmra.mxu1 %vm268_vm1, %v6195_v2  ;;  %5717 = vmatprep.mubr.msk.f32.mxu0 %vm268_vm1, %v7412_v16  ;;  %v7439_v16 = vld [vmem:[#allocation27_spill] sm:$0xff]  ;;  %v4881_v33 = vld [vmem:[%s5806_s23 + $0x169] sm:$0xff] }
 0x115   : > { %v6782_v52 = vadd.f32 %v1413_v35, %v1062_v12  ;;  %v1065_v0 = vadd.f32 %v5366_v38, %v6536_v6  ;;  %5667 = vmatprep.mubr.msk.f32.mxu1 %vm268_vm1, %v6201_v60  ;;  %v1423_v8 = vpop.f32.mrf.mxu0  ;;  %v7437_v60 = vld [vmem:[#allocation4_spill] sm:$0xff]  ;;  %v7452_v38 = vld [vmem:[#allocation9_spill] sm:$0xff] }
 0x116   : > { %v969_v10 = vpop.f32.mrf.mxu1  ;;  %v4947_v35 = vld [vmem:[%s5806_s23 + $0x16a] sm:$0xff] }
 0x117   : > { %v6789_v56 = vadd.f32 %v5416_v53, %v1065_v0  ;;  %v1064_v20 = vadd.f32 %v969_v10, %v6548_v45  ;;  %v5419_v55 = vpop.f32.mrf.mxu0  ;;  %5718 = vmatmul.mubr.msk.f32.gmra.mxu0 %vm268_vm1, %v7436_v11 }
 0x118   : > { %v5369_v2 = vpop.f32.mrf.mxu1  ;;  %5668 = vmatmul.mubr.msk.f32.gmra.mxu1 %vm268_vm1, %v6215_v62  ;;  %5720 = vmatprep.mubr.msk.f32.mxu0 %vm268_vm1, %v7439_v16 }
 0x119   : > { %v6796_v6 = vadd.f32 %v1423_v8, %v1064_v20  ;;  %v1067_v36 = vadd.f32 %v5369_v2, %v7437_v60  ;;  %5670 = vmatprep.mubr.msk.f32.mxu1 %vm268_vm1, %v7438_v14  ;;  %v1433_v45 = vpop.f32.mrf.mxu0  ;;  %v7453_v8 = vld [vmem:[#allocation36_spill] sm:$0xff]  ;;  %v7454_v20 = vld [vmem:[#allocation37_spill] sm:$0xff] }
 0x11a   : > { %v979_v28 = vpop.f32.mrf.mxu1  ;;  %v4882_v60 = vld [vmem:[%s5806_s23 + $0x171] sm:$0xff] }
 0x11b   : > { %v6803_v57 = vadd.f32 %v5419_v55, %v1067_v36  ;;  %v1066_v59 = vadd.f32 %v979_v28, %v7440_v7  ;;  %v5422_v17 = vpop.f32.mrf.mxu0  ;;  %5721 = vmatmul.mubr.msk.f32.gmra.mxu0 %vm268_vm1, %v7442_v40  ;;  %v7455_v55 = vld [vmem:[#allocation10_spill] sm:$0xff] }
 0x11c   : > { %v5372_v62 = vpop.f32.mrf.mxu1  ;;  %5671 = vmatmul.mubr.msk.f32.gmra.mxu1 %vm268_vm1, %v7441_v19  ;;  %5723 = vmatprep.mubr.msk.f32.mxu0 %vm268_vm1, %v7445_v23  ;;  %v4948_v36 = vld [vmem:[%s5806_s23 + $0x172] sm:$0xff]  ;;  %v7457_v19 = vld [vmem:[#allocation12_spill] sm:$0xff] }
 0x11d   : > { %v6810_v61 = vadd.f32 %v1433_v45, %v1066_v59  ;;  %v1069_v63 = vadd.f32 %v5372_v62, %v7443_v43  ;;  %5673 = vmatprep.mubr.msk.f32.mxu1 %vm268_vm1, %v7444_v21  ;;  %v1443_v1 = vpop.f32.mrf.mxu0  ;;  %v7456_v45 = vld [vmem:[#allocation11_spill] sm:$0xff]  ;;  %v7458_v43 = vld [vmem:[#allocation40_spill] sm:$0xff] }
 0x11e   : > { %v989_v41 = vpop.f32.mrf.mxu1 }
 0x11f   : > { %v6817_v47 = vadd.f32 %v5422_v17, %v1069_v63  ;;  %v1068_v25 = vadd.f32 %v989_v41, %v7446_v3  ;;  %v5425_v46 = vpop.f32.mrf.mxu0  ;;  %5724 = vmatmul.mubr.msk.f32.gmra.mxu0 %vm268_vm1, %v7448_v51  ;;  %v7459_v63 = vld [vmem:[#allocation14_spill] sm:$0xff]  ;;  %v7461_v51 = vld [vmem:[#allocation3_spill] sm:$0xff] }
 0x120   : > { %v5375_v27 = vpop.f32.mrf.mxu1  ;;  %5674 = vmatmul.mubr.msk.f32.gmra.mxu1 %vm268_vm1, %v7447_v9  ;;  %5726 = vmatprep.mubr.msk.f32.mxu0 %vm268_vm1, %v7451_v39  ;;  %v4885_v41 = vld [vmem:[%s5806_s23 + $0x199] sm:$0xff] }
 0x121   : > { %v6824_v37 = vadd.f32 %v1443_v1, %v1068_v25  ;;  %v1071_v24 = vadd.f32 %v5375_v27, %v7449_v31  ;;  %5676 = vmatprep.mubr.msk.f32.mxu1 %vm268_vm1, %v7450_v42  ;;  %v1453_v5 = vpop.f32.mrf.mxu0  ;;  %v4951_v1 = vld [vmem:[%s5806_s23 + $0x19a] sm:$0xff]  ;;  %v7460_v25 = vld [vmem:[#allocation13_spill] sm:$0xff]  ;;  %v7462_v31 = vld [vmem:[#allocation16_spill] sm:$0xff] }
 0x122   : > { %v999_v13 = vpop.f32.mrf.mxu1  ;;  %v7463_v42 = vld [vmem:[#allocation15_spill] sm:$0xff] }
 0x123   : > { %v6833_v12 = vadd.f32 %v5425_v46, %v1071_v24  ;;  %v1070_v53 = vadd.f32 %v999_v13, %v7452_v38  ;;  %v5428_v10 = vpop.f32.mrf.mxu0  ;;  %5727 = vmatmul.mubr.msk.f32.gmra.mxu0 %vm268_vm1, %v7454_v20  ;;  %v4886_v13 = vld [vmem:[%s5806_s23 + $0x1a1] sm:$0xff] }
 0x124   : > { %v5378_v0 = vpop.f32.mrf.mxu1  ;;  %5677 = vmatmul.mubr.msk.f32.gmra.mxu1 %vm268_vm1, %v7453_v8  ;;  %5729 = vmatprep.mubr.msk.f32.mxu0 %vm268_vm1, %v4947_v35 }
 0x125   : > { %v6840_v2 = vadd.f32 %v1453_v5, %v1070_v53  ;;  %v1073_v11 = vadd.f32 %v5378_v0, %v7455_v55  ;;  %5679 = vmatprep.mubr.msk.f32.mxu1 %vm268_vm1, %v4881_v33  ;;  %v1463_v16 = vpop.f32.mrf.mxu0  ;;  %v4952_v5 = vld [vmem:[%s5806_s23 + $0x1a2] sm:$0xff]  ;;  %v7464_v53 = vld [vmem:[#allocation17_spill] sm:$0xff]  ;;  %v7465_v55 = vld [vmem:[#allocation18_spill] sm:$0xff] }
 0x126   : > { %v1009_v14 = vpop.f32.mrf.mxu1 }
 0x127   : > { %v6847_v28 = vadd.f32 %v5428_v10, %v1073_v11  ;;  %v1072_v7 = vadd.f32 %v1009_v14, %v7456_v45  ;;  %v5431_v62 = vpop.f32.mrf.mxu0  ;;  %5730 = vmatmul.mubr.msk.f32.gmra.mxu0 %vm268_vm1, %v4948_v36 }
 0x128   : > { %v5381_v59 = vpop.f32.mrf.mxu1  ;;  %5680 = vmatmul.mubr.msk.f32.gmra.mxu1 %vm268_vm1, %v4882_v60  ;;  %5732 = vmatprep.mubr.msk.f32.mxu0 %vm268_vm1, %v7459_v63 }
 0x129   : > { %v6852_v17 = vadd.f32 %v1463_v16, %v1072_v7  ;;  %v1075_v40 = vadd.f32 %v5381_v59, %v7457_v19  ;;  %5682 = vmatprep.mubr.msk.f32.mxu1 %vm268_vm1, %v7458_v43  ;;  %v1473_v23 = vpop.f32.mrf.mxu0  ;;  %v7466_v16 = vld [vmem:[#allocation19_spill] sm:$0xff] }
 0x12a   : > { %v1019_v21 = vpop.f32.mrf.mxu1 }
 0x12b   : > { %v6861_v3 = vadd.f32 %v5431_v62, %v1075_v40  ;;  %v1074_v27 = vadd.f32 %v1019_v21, %v7460_v25  ;;  %v5434_v9 = vpop.f32.mrf.mxu0  ;;  %5733 = vmatmul.mubr.msk.f32.gmra.mxu0 %vm268_vm1, %v7462_v31 }
 0x12c   : > { %v5384_v46 = vpop.f32.mrf.mxu1  ;;  %5683 = vmatmul.mubr.msk.f32.gmra.mxu1 %vm268_vm1, %v7461_v51  ;;  %5735 = vmatprep.mubr.msk.f32.mxu0 %vm268_vm1, %v4951_v1 }
 0x12d   : > { %v6868_v24 = vadd.f32 %v1473_v23, %v1074_v27  ;;  %v1077_v39 = vadd.f32 %v5384_v46, %v7463_v42  ;;  %5685 = vmatprep.mubr.msk.f32.mxu1 %vm268_vm1, %v4885_v41  ;;  %v1483_v35 = vpop.f32.mrf.mxu0 }
 0x12e   : > { %v1029_v33 = vpop.f32.mrf.mxu1 }
 0x12f   : > { %v6875_v38 = vadd.f32 %v5434_v9, %v1077_v39  ;;  %v1076_v0 = vadd.f32 %v1029_v33, %v7464_v53  ;;  %v5437_v8 = vpop.f32.mrf.mxu0  ;;  %5736 = vmatmul.mubr.msk.f32.gmra.mxu0 %vm268_vm1, %v4952_v5 }
 0x130   : > { %v5387_v10 = vpop.f32.mrf.mxu1  ;;  %5686 = vmatmul.mubr.msk.f32.gmra.mxu1 %vm268_vm1, %v4886_v13 }
 0x131   : > { %v6880_v20 = vadd.f32 %v1483_v35, %v1076_v0  ;;  %v1079_v11 = vadd.f32 %v5387_v10, %v7465_v55  ;;  %v1493_v36 = vpop.f32.mrf.mxu0 }
 0x132   : > { %v1039_v60 = vpop.f32.mrf.mxu1 }
 0x133   : > { %v6883_v14 = vadd.f32 %v5437_v8, %v1079_v11  ;;  %v1078_v45 = vadd.f32 %v1039_v60, %v7466_v16  ;;  %v5492_v59 = vpop.f32.mrf.mxu0 }
 0x134   : > { %v5442_v7 = vpop.f32.mrf.mxu1 }
 0x135   : > { %v6886_v62 = vadd.f32 %v1493_v36, %v1078_v45  ;;  %v1958_v19 = vadd.f32 %v5442_v7, %v6677_v54  ;;  %v2252_v43 = vpop.f32.mrf.mxu0 }
 0x136   : > { %v1798_v40 = vpop.f32.mrf.mxu1 }
 0x137   : > { %v6889_v63 = vadd.f32 %v5492_v59, %v1958_v19  ;;  %v1957_v21 = vadd.f32 %v1798_v40, %v6684_v49  ;;  %v5495_v41 = vpop.f32.mrf.mxu0 }
 0x138   : > { %v5445_v23 = vpop.f32.mrf.mxu1 }
 0x139   : > { %v6892_v1 = vadd.f32 %v2252_v43, %v1957_v21  ;;  %v1960_v25 = vadd.f32 %v5445_v23, %v6691_v4  ;;  %v2262_v46 = vpop.f32.mrf.mxu0 }
 0x13a   : > { %v1808_v27 = vpop.f32.mrf.mxu1 }
 0x13b   : > { %v6895_v9 = vadd.f32 %v5495_v41, %v1960_v25  ;;  %v1959_v51 = vadd.f32 %v1808_v27, %v6698_v15  ;;  %v5498_v54 = vpop.f32.mrf.mxu0 }
 0x13c   : > { %v5448_v31 = vpop.f32.mrf.mxu1 }
 0x13d   : > { %v6898_v42 = vadd.f32 %v2262_v46, %v1959_v51  ;;  %v1962_v39 = vadd.f32 %v5448_v31, %v6705_v18  ;;  %v2272_v49 = vpop.f32.mrf.mxu0 }
 0x13e   : > { %v1818_v13 = vpop.f32.mrf.mxu1 }
 0x13f   : > { %v6901_v5 = vadd.f32 %v5498_v54, %v1962_v39  ;;  %v1961_v33 = vadd.f32 %v1818_v13, %v6712_v48  ;;  %v5501_v4 = vpop.f32.mrf.mxu0 }
 0x140   : > { %v5451_v35 = vpop.f32.mrf.mxu1 }
 0x141   : > { %v6904_v53 = vadd.f32 %v2272_v49, %v1961_v33  ;;  %v1964_v0 = vadd.f32 %v5451_v35, %v6719_v22  ;;  %v2282_v15 = vpop.f32.mrf.mxu0 }
 0x142   : > { %v1828_v10 = vpop.f32.mrf.mxu1 }
 0x143   : > { %v6907_v8 = vadd.f32 %v5501_v4, %v1964_v0  ;;  %v1963_v55 = vadd.f32 %v1828_v10, %v6726_v50  ;;  %v5504_v18 = vpop.f32.mrf.mxu0 }
 0x144   : > { %v5454_v11 = vpop.f32.mrf.mxu1 }
 0x145   : > { %v6910_v60 = vadd.f32 %v2282_v15, %v1963_v55  ;;  %v1966_v36 = vadd.f32 %v5454_v11, %v6733_v26  ;;  %v2292_v48 = vpop.f32.mrf.mxu0 }
 0x146   : > { %v1838_v16 = vpop.f32.mrf.mxu1 }
 0x147   : > { %v6913_v45 = vadd.f32 %v5504_v18, %v1966_v36  ;;  %v1965_v7 = vadd.f32 %v1838_v16, %v6740_v58  ;;  %v5507_v22 = vpop.f32.mrf.mxu0 }
 0x148   : > { %v5457_v59 = vpop.f32.mrf.mxu1 }
 0x149   : > { %v6916_v19 = vadd.f32 %v2292_v48, %v1965_v7  ;;  %v1968_v40 = vadd.f32 %v5457_v59, %v6747_v30  ;;  %v2302_v50 = vpop.f32.mrf.mxu0 }
 0x14a   : > { %v1848_v43 = vpop.f32.mrf.mxu1 }
 0x14b   : > { %v6919_v21 = vadd.f32 %v5507_v22, %v1968_v40  ;;  %v1967_v23 = vadd.f32 %v1848_v43, %v6754_v29  ;;  %v5510_v26 = vpop.f32.mrf.mxu0 }
 0x14c   : > { %v5460_v41 = vpop.f32.mrf.mxu1 }
 0x14d   : > { %v6922_v25 = vadd.f32 %v2302_v50, %v1967_v23  ;;  %v1970_v27 = vadd.f32 %v5460_v41, %v6761_v34  ;;  %v2312_v58 = vpop.f32.mrf.mxu0 }
 0x14e   : > { %v1858_v46 = vpop.f32.mrf.mxu1 }
 0x14f   : > { %v6925_v51 = vadd.f32 %v5510_v26, %v1970_v27  ;;  %v1969_v31 = vadd.f32 %v1858_v46, %v6768_v44  ;;  %v5513_v30 = vpop.f32.mrf.mxu0 }
 0x150   : > { %v5463_v54 = vpop.f32.mrf.mxu1 }
 0x151   : > { %v6928_v39 = vadd.f32 %v2312_v58, %v1969_v31  ;;  %v1972_v13 = vadd.f32 %v5463_v54, %v6775_v32  ;;  %v2322_v29 = vpop.f32.mrf.mxu0 }
 0x152   : > { %v1868_v49 = vpop.f32.mrf.mxu1 }
 0x153   : > { %v6931_v33 = vadd.f32 %v5513_v30, %v1972_v13  ;;  %v1971_v35 = vadd.f32 %v1868_v49, %v6782_v52  ;;  %v5516_v34 = vpop.f32.mrf.mxu0 }
 0x154   : > { %v5466_v4 = vpop.f32.mrf.mxu1 }
 0x155   : > { %v6934_v0 = vadd.f32 %v2322_v29, %v1971_v35  ;;  %v1974_v10 = vadd.f32 %v5466_v4, %v6789_v56  ;;  %v2332_v44 = vpop.f32.mrf.mxu0 }
 0x156   : > { %v1878_v15 = vpop.f32.mrf.mxu1 }
 0x157   : > { %v6937_v55 = vadd.f32 %v5516_v34, %v1974_v10  ;;  %v1973_v11 = vadd.f32 %v1878_v15, %v6796_v6  ;;  %v5519_v32 = vpop.f32.mrf.mxu0 }
 0x158   : > { %v5469_v18 = vpop.f32.mrf.mxu1 }
 0x159   : > { %v6940_v36 = vadd.f32 %v2332_v44, %v1973_v11  ;;  %v1976_v16 = vadd.f32 %v5469_v18, %v6803_v57  ;;  %v2342_v52 = vpop.f32.mrf.mxu0 }
 0x15a   : > { %v1888_v48 = vpop.f32.mrf.mxu1 }
 0x15b   : > { %v6943_v7 = vadd.f32 %v5519_v32, %v1976_v16  ;;  %v1975_v59 = vadd.f32 %v1888_v48, %v6810_v61  ;;  %v5522_v56 = vpop.f32.mrf.mxu0 }
 0x15c   : > { %v5472_v22 = vpop.f32.mrf.mxu1 }
 0x15d   : > { %7467 = vst [vmem:[#allocation20_spill] sm:$0xff] %v6943_v7  ;;  %v6946_v40 = vadd.f32 %v2342_v52, %v1975_v59  ;;  %v1978_v43 = vadd.f32 %v5472_v22, %v6817_v47  ;;  %v2352_v6 = vpop.f32.mrf.mxu0 }
 0x15e   : > { %v1898_v50 = vpop.f32.mrf.mxu1 }
 0x15f   : > { %7468 = vst [vmem:[#allocation21_spill] sm:$0xff] %v6946_v40  ;;  %v6949_v23 = vadd.f32 %v5522_v56, %v1978_v43  ;;  %v1977_v41 = vadd.f32 %v1898_v50, %v6824_v37  ;;  %v5525_v57 = vpop.f32.mrf.mxu0 }
 0x160   : > { %v5475_v26 = vpop.f32.mrf.mxu1 }
 0x161   : > { %7469 = vst [vmem:[#allocation22_spill] sm:$0xff] %v6949_v23  ;;  %v6952_v27 = vadd.f32 %v2352_v6, %v1977_v41  ;;  %v1980_v46 = vadd.f32 %v5475_v26, %v6833_v12  ;;  %v2362_v61 = vpop.f32.mrf.mxu0 }
 0x162   : > { %v1908_v58 = vpop.f32.mrf.mxu1 }
 0x163   : > { %7470 = vst [vmem:[#allocation23_spill] sm:$0xff] %v6952_v27  ;;  %v6955_v31 = vadd.f32 %v5525_v57, %v1980_v46  ;;  %v1979_v54 = vadd.f32 %v1908_v58, %v6840_v2  ;;  %v5528_v47 = vpop.f32.mrf.mxu0 }
 0x164   : > { %v5478_v30 = vpop.f32.mrf.mxu1 }
 0x165   : > { %7471 = vst [vmem:[#allocation24_spill] sm:$0xff] %v6955_v31  ;;  %v6958_v13 = vadd.f32 %v2362_v61, %v1979_v54  ;;  %v1982_v49 = vadd.f32 %v5478_v30, %v6847_v28  ;;  %v2372_v37 = vpop.f32.mrf.mxu0 }
 0x166   : > { %v1918_v29 = vpop.f32.mrf.mxu1 }
 0x167   : > { %7472 = vst [vmem:[#allocation38_spill] sm:$0xff] %v6958_v13  ;;  %v6961_v35 = vadd.f32 %v5528_v47, %v1982_v49  ;;  %v1981_v4 = vadd.f32 %v1918_v29, %v6852_v17  ;;  %v5531_v12 = vpop.f32.mrf.mxu0 }
 0x168   : > { %v5481_v34 = vpop.f32.mrf.mxu1 }
 0x169   : > { %7473 = vst [vmem:[#allocation39_spill] sm:$0xff] %v6961_v35  ;;  %v6964_v10 = vadd.f32 %v2372_v37, %v1981_v4  ;;  %v1984_v15 = vadd.f32 %v5481_v34, %v6861_v3  ;;  %v2382_v2 = vpop.f32.mrf.mxu0 }
 0x16a   : > { %v1928_v44 = vpop.f32.mrf.mxu1 }
 0x16b   : > { %7474 = vst [vmem:[#allocation25_spill] sm:$0xff] %v6964_v10  ;;  %v6967_v11 = vadd.f32 %v5531_v12, %v1984_v15  ;;  %v1983_v18 = vadd.f32 %v1928_v44, %v6868_v24  ;;  %v5534_v28 = vpop.f32.mrf.mxu0 }
 0x16c   : > { %v5484_v32 = vpop.f32.mrf.mxu1 }
 0x16d   : > { %7475 = vst [vmem:[#allocation4_spill] sm:$0xff] %v6967_v11  ;;  %v6970_v16 = vadd.f32 %v2382_v2, %v1983_v18  ;;  %v1986_v48 = vadd.f32 %v5484_v32, %v6875_v38  ;;  %v2392_v17 = vpop.f32.mrf.mxu0 }
 0x16e   : > { %v1938_v52 = vpop.f32.mrf.mxu1 }
 0x16f   : > { %7476 = vst [vmem:[#allocation26_spill] sm:$0xff] %v6970_v16  ;;  %v6973_v59 = vadd.f32 %v5534_v28, %v1986_v48  ;;  %v1985_v22 = vadd.f32 %v1938_v52, %v6880_v20  ;;  %v5537_v3 = vpop.f32.mrf.mxu0 }
 0x170   : > { %v5487_v56 = vpop.f32.mrf.mxu1 }
 0x171   : > { %7477 = vst [vmem:[#allocation27_spill] sm:$0xff] %v6973_v59  ;;  %v6976_v43 = vadd.f32 %v2392_v17, %v1985_v22  ;;  %v1988_v50 = vadd.f32 %v5487_v56, %v6883_v14  ;;  %v2402_v24 = vpop.f32.mrf.mxu0 }
 0x172   : > { %v1948_v6 = vpop.f32.mrf.mxu1 }
 0x173   : > { %7478 = vst [vmem:[#allocation5_spill] sm:$0xff] %v6976_v43  ;;  %v6979_v41 = vadd.f32 %v5537_v3, %v1988_v50  ;;  %v1987_v26 = vadd.f32 %v1948_v6, %v6886_v62  ;;  %v6982_v38 = vpop.f32.mrf.mxu0 }
 0x174   : > { %v5542_v57 = vpop.f32.mrf.mxu1 }
 0x175   : > { %7479 = vst [vmem:[#allocation28_spill] sm:$0xff] %v6979_v41  ;;  %v6984_v46 = vadd.f32 %v2402_v24, %v1987_v26  ;;  %v6986_v61 = vpop.f32.mrf.mxu0 }
 0x176   : > { %v2706_v58 = vpop.f32.mrf.mxu1 }
 0x177   : > { %7480 = vst [vmem:[#allocation29_spill] sm:$0xff] %v6984_v46  ;;  %v6990_v54 = vpop.f32.mrf.mxu0 }
 0x178   : > { %v6988_v20 = vpop.f32.mrf.mxu1 }
 0x179   : > { %v6994_v14 = vpop.f32.mrf.mxu0 }
 0x17a   : > { %v6992_v30 = vpop.f32.mrf.mxu1 }
 0x17b   : > { %v6998_v49 = vpop.f32.mrf.mxu0 }
 0x17c   : > { %v6996_v47 = vpop.f32.mrf.mxu1 }
 0x17d   : > { %v7002_v29 = vpop.f32.mrf.mxu0 }
 0x17e   : > { %v7000_v62 = vpop.f32.mrf.mxu1 }
 0x17f   : > { %v7006_v4 = vpop.f32.mrf.mxu0 }
 0x180   : > { %v7004_v37 = vpop.f32.mrf.mxu1 }
 0x181   : > { %v7010_v12 = vpop.f32.mrf.mxu0 }
 0x182   : > { %v7008_v34 = vpop.f32.mrf.mxu1 }
 0x183   : > { %v7014_v44 = vpop.f32.mrf.mxu0 }
 0x184   : > { %v7012_v15 = vpop.f32.mrf.mxu1 }
 0x185   : > { %v7018_v18 = vpop.f32.mrf.mxu0 }
 0x186   : > { %v7016_v2 = vpop.f32.mrf.mxu1 }
 0x187   : > { %v7022_v28 = vpop.f32.mrf.mxu0 }
 0x188   : > { %v7020_v32 = vpop.f32.mrf.mxu1 }
 0x189   : > { %v7026_v52 = vpop.f32.mrf.mxu0 }
 0x18a   : > { %v7024_v48 = vpop.f32.mrf.mxu1 }
 0x18b   : > { %v7030_v22 = vpop.f32.mrf.mxu0 }
 0x18c   : > { %v7028_v17 = vpop.f32.mrf.mxu1 }
 0x18d   : > { %v7034_v3 = vpop.f32.mrf.mxu0 }
 0x18e   : > { %v7032_v56 = vpop.f32.mrf.mxu1 }
 0x18f   : > { %v7038_v6 = vpop.f32.mrf.mxu0 }
 0x190   : > { %v7036_v50 = vpop.f32.mrf.mxu1 }
 0x191   : > { %v7042_v26 = vpop.f32.mrf.mxu0 }
 0x192   : > { %v7040_v24 = vpop.f32.mrf.mxu1 }
 0x193   : > { %v7046_v41 = vpop.f32.mrf.mxu0 }
 0x194   : > { %v7044_v46 = vpop.f32.mrf.mxu1 }
 0x195   : > { %v7050_v59 = vpop.f32.mrf.mxu0 }
 0x196   : > { %v7048_v43 = vpop.f32.mrf.mxu1  ;;  %7481 = vst [vmem:[#allocation6_spill] sm:$0xff] %v7050_v59 }
 0x197   : > { %v7054_v11 = vpop.f32.mrf.mxu0 }
 0x198   : > { %v7052_v16 = vpop.f32.mrf.mxu1  ;;  %7483 = vst [vmem:[#allocation31_spill] sm:$0xff] %v7054_v11 }
 0x199   : > { %7482 = vst [vmem:[#allocation30_spill] sm:$0xff] %v7052_v16  ;;  %v7058_v35 = vpop.f32.mrf.mxu0 }
 0x19a   : > { %v7056_v10 = vpop.f32.mrf.mxu1  ;;  %7485 = vst [vmem:[#allocation32_spill] sm:$0xff] %v7058_v35 }
 0x19b   : > { %7484 = vst [vmem:[#allocation7_spill] sm:$0xff] %v7056_v10  ;;  %v7062_v31 = vpop.f32.mrf.mxu0 }
 0x19c   : > { %v7060_v13 = vpop.f32.mrf.mxu1  ;;  %7487 = vst [vmem:[#allocation8_spill] sm:$0xff] %v7062_v31 }
 0x19d   : > { %7486 = vst [vmem:[#allocation33_spill] sm:$0xff] %v7060_v13  ;;  %v7066_v23 = vpop.f32.mrf.mxu0 }
 0x19e   : > { %v7064_v27 = vpop.f32.mrf.mxu1  ;;  %7489 = vst [vmem:[#allocation35_spill] sm:$0xff] %v7066_v23 }
 0x19f   : > { %7488 = vst [vmem:[#allocation34_spill] sm:$0xff] %v7064_v27  ;;  %v7070_v7 = vpop.f32.mrf.mxu0 }
 0x1a0   : > { %v7068_v40 = vpop.f32.mrf.mxu1  ;;  %7491 = vst [vmem:[#allocation36_spill] sm:$0xff] %v7070_v7 }
 0x1a1   : > { %7490 = vst [vmem:[#allocation9_spill] sm:$0xff] %v7068_v40  ;;  %v7074_v16 = vpop.f32.mrf.mxu0 }
 0x1a2   : > { %v7072_v59 = vpop.f32.mrf.mxu1  ;;  %7493 = vst [vmem:[#allocation10_spill] sm:$0xff] %v7074_v16 }
 0x1a3   : > { %7492 = vst [vmem:[#allocation37_spill] sm:$0xff] %v7072_v59  ;;  %v7078_v10 = vpop.f32.mrf.mxu0 }
 0x1a4   : > { %v7076_v11 = vpop.f32.mrf.mxu1  ;;  %7495 = vst [vmem:[#allocation12_spill] sm:$0xff] %v7078_v10  ;;  %v2866_v10 = vadd.f32 %v5542_v57, %v6889_v63  ;;  %v2867_v57 = vadd.f32 %v6992_v30, %v6898_v42 }
 0x1a5   : > { %7494 = vst [vmem:[#allocation11_spill] sm:$0xff] %v7076_v11  ;;  %v7082_v13 = vpop.f32.mrf.mxu0 }
 0x1a6   : > { %v7080_v35 = vpop.f32.mrf.mxu1  ;;  %7497 = vst [vmem:[#allocation14_spill] sm:$0xff] %v7082_v13 }
 0x1a7   : > { %7496 = vst [vmem:[#allocation40_spill] sm:$0xff] %v7080_v35  ;;  %v7086_v27 = vpop.f32.mrf.mxu0 }
 0x1a8   : > { %v7084_v31 = vpop.f32.mrf.mxu1  ;;  %7498 = vst [vmem:[#allocation13_spill] sm:$0xff] %v7086_v27  ;;  %v2865_v27 = vadd.f32 %v2706_v58, %v6892_v1  ;;  %v2870_v1 = vadd.f32 %v6996_v47, %v6901_v5  ;;  %v7121_v58 = vld [vmem:[%s7282_s2] ss:$0 sm:$0xff] }
 0x1a9   : > { %v7090_v40 = vpop.f32.mrf.mxu0 }
 0x1aa   : > { %v7088_v23 = vpop.f32.mrf.mxu1  ;;  %7500 = vst [vmem:[#allocation16_spill] sm:$0xff] %v7090_v40  ;;  %v3320_v63 = vadd.f32 %v6986_v61, %v2865_v27  ;;  %v2869_v27 = vadd.f32 %v7000_v62, %v6904_v53  ;;  %v3325_v47 = vadd.f32 %v6998_v49, %v2870_v1  ;;  %v2871_v49 = vadd.f32 %v7008_v34, %v6910_v60 }
 0x1ab   : > { %7499 = vst [vmem:[#allocation3_spill] sm:$0xff] %v7088_v23  ;;  %v7094_v59 = vpop.f32.mrf.mxu0 }
 0x1ac   : > { %v7092_v7 = vpop.f32.mrf.mxu1  ;;  %7502 = vst [vmem:[#allocation17_spill] sm:$0xff] %v7094_v59  ;;  %v2868_v59 = vadd.f32 %v6988_v20, %v6895_v9 }
 0x1ad   : > { %7501 = vst [vmem:[#allocation15_spill] sm:$0xff] %v7092_v7  ;;  %v7098_v11 = vpop.f32.mrf.mxu0  ;;  %v3321_v7 = vadd.f32 %v6982_v38, %v2866_v10 }
 0x1ae   : > { %v7096_v16 = vpop.f32.mrf.mxu1  ;;  %7504 = vst [vmem:[#allocation19_spill] sm:$0xff] %v7098_v11  ;;  %v3323_v9 = vadd.f32 %v6990_v54, %v2868_v59 }
 0x1af   : > { %7503 = vst [vmem:[#allocation18_spill] sm:$0xff] %v7096_v16  ;;  %v7103_v13 = vpop.f32.mrf.mxu0 }
 0x1b0   : > { %v7101_v35 = vpop.f32.mrf.mxu1  ;;  %7505 = vst [vmem:[#allocation41_spill] sm:$0xff] %v7103_v13 }
 0x1b1   : > { %v7108_v40 = vpop.f32.mrf.mxu0 }
 0x1b2   : > { %v7106_v23 = vpop.f32.mrf.mxu1  ;;  %7507 = vst [vmem:[#allocation43_spill] sm:$0xff] %v7108_v40 }
 0x1b3   : > { %7506 = vst [vmem:[#allocation42_spill] sm:$0xff] %v7106_v23  ;;  %v5692_v11 = vpop.f32.mrf.mxu0  ;;  %v2872_v23 = vadd.f32 %v7004_v37, %v6907_v8 }
 0x1b4   : > { %v5642_v16 = vpop.f32.mrf.mxu1 }
 0x1b5   : > { %v3775_v13 = vadd.f32 %v5642_v16, %v3321_v7  ;;  %v4069_v38 = vpop.f32.mrf.mxu0  ;;  %v3322_v16 = vadd.f32 %v6994_v14, %v2867_v57  ;;  %v3324_v14 = vadd.f32 %v7002_v29, %v2869_v27 }
 0x1b6   : > { %v3615_v10 = vpop.f32.mrf.mxu1 }
 0x1b7   : > { %v4229_v20 = vadd.f32 %v5692_v11, %v3775_v13  ;;  %v3774_v40 = vadd.f32 %v3615_v10, %v3320_v63  ;;  %v5695_v7 = vpop.f32.mrf.mxu0  ;;  %v3327_v10 = vadd.f32 %v7006_v4, %v2872_v23 }
 0x1b8   : > { %v5645_v42 = vpop.f32.mrf.mxu1 }
 0x1b9   : > { %v4332_v5 = vadd.f32 %v7121_v58, %v4229_v20  ;;  %v4228_v61 = vadd.f32 %v4069_v38, %v3774_v40  ;;  %v3777_v30 = vadd.f32 %v5645_v42, %v3323_v9  ;;  %v4079_v13 = vpop.f32.mrf.mxu0  ;;  %v2874_v38 = vadd.f32 %v7012_v15, %v6913_v45 }
 0x1ba   : > { %v3625_v53 = vpop.f32.mrf.mxu1  ;;  %v3326_v42 = vadd.f32 %v7010_v12, %v2871_v49 }
 0x1bb   : > { %v4364_v11 = vmax.f32 %v4332_v5, 0.0  ;;  %v4331_v59 = vadd.f32 %v7121_v58, %v4228_v61  ;;  %v4231_v54 = vadd.f32 %v5695_v7, %v3777_v30  ;;  %v3776_v40 = vadd.f32 %v3625_v53, %v3322_v16  ;;  %v5698_v62 = vpop.f32.mrf.mxu0 }
 0x1bc   : > { %v5648_v8 = vpop.f32.mrf.mxu1  ;;  %v2873_v7 = vadd.f32 %v7016_v2, %v6916_v19  ;;  %v3329_v61 = vadd.f32 %v7014_v44, %v2874_v38  ;;  %v2876_v30 = vadd.f32 %v7020_v32, %v6919_v21 }
 0x1bd   : > { %4396 = vst [vmem:[%s7135_s15 + $0x8] sm:$0xff] %v4364_v11  ;;  %v4363_v37 = vmax.f32 %v4331_v59, 0.0  ;;  %v4334_v63 = vadd.f32 %v7121_v58, %v4231_v54  ;;  %v4230_v57 = vadd.f32 %v4079_v13, %v3776_v40  ;;  %v3779_v1 = vadd.f32 %v5648_v8, %v3325_v47  ;;  %v4089_v20 = vpop.f32.mrf.mxu0 }
 0x1be   : > { %v3635_v9 = vpop.f32.mrf.mxu1  ;;  %v3328_v11 = vadd.f32 %v7018_v18, %v2873_v7  ;;  %v2875_v59 = vadd.f32 %v7024_v48, %v6922_v25  ;;  %v3331_v49 = vadd.f32 %v7022_v28, %v2876_v30  ;;  %v2878_v8 = vadd.f32 %v7028_v17, %v6925_v51 }
 0x1bf   : > { %4395 = vst [vmem:[%s7135_s15] sm:$0xff] %v4363_v37  ;;  %v4366_v29 = vmax.f32 %v4334_v63, 0.0  ;;  %v4333_v60 = vadd.f32 %v7121_v58, %v4230_v57  ;;  %v4233_v34 = vadd.f32 %v5698_v62, %v3779_v1  ;;  %v3778_v27 = vadd.f32 %v3635_v9, %v3324_v14  ;;  %v5701_v5 = vpop.f32.mrf.mxu0 }
 0x1c0   : > { %v5651_v16 = vpop.f32.mrf.mxu1  ;;  %v3330_v57 = vadd.f32 %v7026_v52, %v2875_v59  ;;  %v2877_v1 = vadd.f32 %v7032_v56, %v6928_v39  ;;  %v2879_v7 = vadd.f32 %v7040_v24, %v6934_v0  ;;  %v7509_v59 = vld [vmem:[#allocation30_spill] sm:$0xff] }
 0x1c1   : > { %4398 = vst [vmem:[%s7135_s15 + $0x18] sm:$0xff] %v4366_v29  ;;  %v4365_v23 = vmax.f32 %v4333_v60, 0.0  ;;  %v4336_v45 = vadd.f32 %v7121_v58, %v4233_v34  ;;  %v4232_v4 = vadd.f32 %v4089_v20, %v3778_v27  ;;  %v3781_v15 = vadd.f32 %v5651_v16, %v3327_v10  ;;  %v4099_v53 = vpop.f32.mrf.mxu0 }
 0x1c2   : > { %v3645_v47 = vpop.f32.mrf.mxu1  ;;  %v3333_v20 = vadd.f32 %v7030_v22, %v2878_v8  ;;  %v2880_v29 = vadd.f32 %v7036_v50, %v6931_v33  ;;  %v7512_v8 = vld [vmem:[#allocation7_spill] sm:$0xff] }
 0x1c3   : > { %4397 = vst [vmem:[%s7135_s15 + $0x10] sm:$0xff] %v4365_v23  ;;  %v4368_v12 = vmax.f32 %v4336_v45, 0.0  ;;  %v4335_v19 = vadd.f32 %v7121_v58, %v4232_v4  ;;  %v4235_v2 = vadd.f32 %v5701_v5, %v3781_v15  ;;  %v3780_v13 = vadd.f32 %v3645_v47, %v3326_v42  ;;  %v5704_v40 = vpop.f32.mrf.mxu0 }
 0x1c4   : > { %v5654_v54 = vpop.f32.mrf.mxu1  ;;  %v3332_v42 = vadd.f32 %v7034_v3, %v2877_v1  ;;  %v3335_v45 = vadd.f32 %v7038_v6, %v2880_v29  ;;  %v2882_v4 = vadd.f32 %v7044_v46, %v6937_v55  ;;  %v3334_v47 = vadd.f32 %v7042_v26, %v2879_v7 }
 0x1c5   : > { %4400 = vst [vmem:[%s7135_s15 + $0x28] sm:$0xff] %v4368_v12  ;;  %v4367_v44 = vmax.f32 %v4335_v19, 0.0  ;;  %v4338_v21 = vadd.f32 %v7121_v58, %v4235_v2  ;;  %v4234_v32 = vadd.f32 %v4099_v53, %v3780_v13  ;;  %v3783_v14 = vadd.f32 %v5654_v54, %v3329_v61  ;;  %v4109_v37 = vpop.f32.mrf.mxu0 }
 0x1c6   : > { %v3655_v62 = vpop.f32.mrf.mxu1  ;;  %v2881_v53 = vadd.f32 %v7048_v43, %v6940_v36  ;;  %v3337_v13 = vadd.f32 %v7046_v41, %v2882_v4  ;;  %v7521_v4 = vld [vmem:[#allocation9_spill] sm:$0xff] }
 0x1c7   : > { %4399 = vst [vmem:[%s7135_s15 + $0x20] sm:$0xff] %v4367_v44  ;;  %v4370_v18 = vmax.f32 %v4338_v21, 0.0  ;;  %v4337_v25 = vadd.f32 %v7121_v58, %v4234_v32  ;;  %v4237_v48 = vadd.f32 %v5704_v40, %v3783_v14  ;;  %v3782_v63 = vadd.f32 %v3655_v62, %v3328_v11  ;;  %v5707_v38 = vpop.f32.mrf.mxu0  ;;  %v7508_v11 = vld [vmem:[#allocation20_spill] sm:$0xff]  ;;  %v7510_v32 = vld [vmem:[#allocation6_spill] sm:$0xff] }
 0x1c8   : > { %v5657_v10 = vpop.f32.mrf.mxu1  ;;  %v2884_v54 = vadd.f32 %v7509_v59, %v7508_v11  ;;  %v3336_v14 = vadd.f32 %v7510_v32, %v2881_v53  ;;  %v7522_v53 = vld [vmem:[#allocation35_spill] sm:$0xff] }
 0x1c9   : > { %4402 = vst [vmem:[%s7135_s15 + $0x38] sm:$0xff] %v4370_v18  ;;  %v4369_v28 = vmax.f32 %v4337_v25, 0.0  ;;  %v4340_v51 = vadd.f32 %v7121_v58, %v4237_v48  ;;  %v4236_v17 = vadd.f32 %v4109_v37, %v3782_v63  ;;  %v3785_v9 = vadd.f32 %v5657_v10, %v3331_v49  ;;  %v4119_v34 = vpop.f32.mrf.mxu0  ;;  %v7511_v49 = vld [vmem:[#allocation21_spill] sm:$0xff]  ;;  %v7514_v10 = vld [vmem:[#allocation22_spill] sm:$0xff] }
 0x1ca   : > { %v3665_v60 = vpop.f32.mrf.mxu1  ;;  %v2883_v62 = vadd.f32 %v7512_v8, %v7511_v49 }
 0x1cb   : > { %4401 = vst [vmem:[%s7135_s15 + $0x30] sm:$0xff] %v4369_v28  ;;  %v4372_v52 = vmax.f32 %v4340_v51, 0.0  ;;  %v4339_v39 = vadd.f32 %v7121_v58, %v4236_v17  ;;  %v4239_v56 = vadd.f32 %v5707_v38, %v3785_v9  ;;  %v3784_v27 = vadd.f32 %v3665_v60, %v3330_v57  ;;  %v5710_v5 = vpop.f32.mrf.mxu0  ;;  %v7513_v57 = vld [vmem:[#allocation31_spill] sm:$0xff]  ;;  %v7515_v38 = vld [vmem:[#allocation33_spill] sm:$0xff] }
 0x1cc   : > { %v5660_v16 = vpop.f32.mrf.mxu1  ;;  %v3339_v1 = vadd.f32 %v7513_v57, %v2884_v54  ;;  %v2886_v28 = vadd.f32 %v7515_v38, %v7514_v10 }
 0x1cd   : > { %4404 = vst [vmem:[%s7135_s15 + $0x48] sm:$0xff] %v4372_v52  ;;  %v4371_v22 = vmax.f32 %v4339_v39, 0.0  ;;  %v4342_v33 = vadd.f32 %v7121_v58, %v4239_v56  ;;  %v4238_v50 = vadd.f32 %v4119_v34, %v3784_v27  ;;  %v3787_v23 = vadd.f32 %v5660_v16, %v3333_v20  ;;  %v4129_v61 = vpop.f32.mrf.mxu0  ;;  %v7516_v34 = vld [vmem:[#allocation32_spill] sm:$0xff]  ;;  %v7517_v39 = vld [vmem:[#allocation23_spill] sm:$0xff]  ;;  %v7518_v56 = vld [vmem:[#allocation34_spill] sm:$0xff] }
 0x1ce   : > { %v3675_v15 = vpop.f32.mrf.mxu1  ;;  %v3338_v52 = vadd.f32 %v7516_v34, %v2883_v62  ;;  %v2885_v27 = vadd.f32 %v7518_v56, %v7517_v39 }
 0x1cf   : > { %4403 = vst [vmem:[%s7135_s15 + $0x40] sm:$0xff] %v4371_v22  ;;  %v4374_v3 = vmax.f32 %v4342_v33, 0.0  ;;  %v4341_v0 = vadd.f32 %v7121_v58, %v4238_v50  ;;  %v4241_v24 = vadd.f32 %v5710_v5, %v3787_v23  ;;  %v3786_v30 = vadd.f32 %v3675_v15, %v3332_v42  ;;  %v5713_v19 = vpop.f32.mrf.mxu0  ;;  %v7519_v50 = vld [vmem:[#allocation8_spill] sm:$0xff] }
 0x1d0   : > { %v5663_v12 = vpop.f32.mrf.mxu1  ;;  %v3341_v23 = vadd.f32 %v7519_v50, %v2886_v28 }
 0x1d1   : > { %4406 = vst [vmem:[%s7135_s15 + $0x58] sm:$0xff] %v4374_v3  ;;  %v4373_v6 = vmax.f32 %v4341_v0, 0.0  ;;  %v4344_v55 = vadd.f32 %v7121_v58, %v4241_v24  ;;  %v4240_v46 = vadd.f32 %v4129_v61, %v3786_v30  ;;  %v3789_v2 = vadd.f32 %v5663_v12, %v3335_v45  ;;  %v4139_v44 = vpop.f32.mrf.mxu0  ;;  %v7520_v45 = vld [vmem:[#allocation24_spill] sm:$0xff] }
 0x1d2   : > { %v3685_v40 = vpop.f32.mrf.mxu1  ;;  %v2888_v15 = vadd.f32 %v7521_v4, %v7520_v45  ;;  %v3340_v12 = vadd.f32 %v7522_v53, %v2885_v27  ;;  %v7533_v27 = vld [vmem:[#allocation14_spill] sm:$0xff]  ;;  %v7536_v4 = vld [vmem:[#allocation13_spill] sm:$0xff] }
 0x1d3   : > { %4405 = vst [vmem:[%s7135_s15 + $0x50] sm:$0xff] %v4373_v6  ;;  %v4376_v26 = vmax.f32 %v4344_v55, 0.0  ;;  %v4343_v36 = vadd.f32 %v7121_v58, %v4240_v46  ;;  %v4243_v43 = vadd.f32 %v5713_v19, %v3789_v2  ;;  %v3788_v21 = vadd.f32 %v3685_v40, %v3334_v47  ;;  %v5716_v18 = vpop.f32.mrf.mxu0  ;;  %v7523_v19 = vld [vmem:[#allocation38_spill] sm:$0xff]  ;;  %v7524_v6 = vld [vmem:[#allocation37_spill] sm:$0xff]  ;;  %v7525_v40 = vld [vmem:[#allocation36_spill] sm:$0xff] }
 0x1d4   : > { %v5666_v37 = vpop.f32.mrf.mxu1  ;;  %v2887_v55 = vadd.f32 %v7524_v6, %v7523_v19  ;;  %v7539_v6 = vld [vmem:[#allocation16_spill] sm:$0xff] }
 0x1d5   : > { %4408 = vst [vmem:[%s7135_s15 + $0x68] sm:$0xff] %v4376_v26  ;;  %v4375_v41 = vmax.f32 %v4343_v36, 0.0  ;;  %v4346_v25 = vadd.f32 %v7121_v58, %v4243_v43  ;;  %v4242_v48 = vadd.f32 %v4139_v44, %v3788_v21  ;;  %v3791_v63 = vadd.f32 %v5666_v37, %v3337_v13  ;;  %v4149_v17 = vpop.f32.mrf.mxu0  ;;  %v7526_v26 = vld [vmem:[#allocation39_spill] sm:$0xff]  ;;  %v7528_v37 = vld [vmem:[#allocation10_spill] sm:$0xff] }
 0x1d6   : > { %v3695_v51 = vpop.f32.mrf.mxu1  ;;  %v3343_v44 = vadd.f32 %v7525_v40, %v2888_v15  ;;  %v7527_v36 = vld [vmem:[#allocation11_spill] sm:$0xff] }
 0x1d7   : > { %4407 = vst [vmem:[%s7135_s15 + $0x60] sm:$0xff] %v4375_v41  ;;  %v4378_v9 = vmax.f32 %v4346_v25, 0.0  ;;  %v4345_v20 = vadd.f32 %v7121_v58, %v4242_v48  ;;  %v4245_v29 = vadd.f32 %v5716_v18, %v3791_v63  ;;  %v3790_v60 = vadd.f32 %v3695_v51, %v3336_v14  ;;  %v5719_v7 = vpop.f32.mrf.mxu0  ;;  %v7529_v41 = vld [vmem:[#allocation25_spill] sm:$0xff]  ;;  %v7530_v25 = vld [vmem:[#allocation40_spill] sm:$0xff] }
 0x1d8   : > { %v5669_v42 = vpop.f32.mrf.mxu1  ;;  %v2890_v43 = vadd.f32 %v7527_v36, %v7526_v26  ;;  %v3342_v18 = vadd.f32 %v7528_v37, %v2887_v55  ;;  %v2889_v48 = vadd.f32 %v7530_v25, %v7529_v41  ;;  %v7531_v51 = vld [vmem:[#allocation12_spill] sm:$0xff]  ;;  %v7542_v36 = vld [vmem:[#allocation17_spill] sm:$0xff]  ;;  %v7544_v41 = vld [vmem:[#allocation19_spill] sm:$0xff] }
 0x1d9   : > { %4410 = vst [vmem:[%s7135_s15 + $0x78] sm:$0xff] %v4378_v9  ;;  %v4377_v16 = vmax.f32 %v4345_v20, 0.0  ;;  %v4348_v5 = vadd.f32 %v7121_v58, %v4245_v29  ;;  %v4244_v22 = vadd.f32 %v4149_v17, %v3790_v60  ;;  %v3793_v33 = vadd.f32 %v5669_v42, %v3339_v1  ;;  %v4159_v3 = vpop.f32.mrf.mxu0  ;;  %v7532_v9 = vld [vmem:[#allocation4_spill] sm:$0xff] }
 0x1da   : > { %v3705_v61 = vpop.f32.mrf.mxu1  ;;  %v3345_v17 = vadd.f32 %v7531_v51, %v2890_v43  ;;  %v2892_v20 = vadd.f32 %v7084_v31, %v7532_v9  ;;  %v3344_v42 = vadd.f32 %v7533_v27, %v2889_v48  ;;  %v7545_v48 = vld [vmem:[#allocation29_spill] sm:$0xff] }
 0x1db   : > { %4409 = vst [vmem:[%s7135_s15 + $0x70] sm:$0xff] %v4377_v16  ;;  %v4380_v0 = vmax.f32 %v4348_v5, 0.0  ;;  %v4347_v24 = vadd.f32 %v7121_v58, %v4244_v22  ;;  %v4247_v30 = vadd.f32 %v5719_v7, %v3793_v33  ;;  %v3792_v47 = vadd.f32 %v3705_v61, %v3338_v52  ;;  %v5722_v2 = vpop.f32.mrf.mxu0  ;;  %v7534_v7 = vld [vmem:[#allocation26_spill] sm:$0xff]  ;;  %v7535_v16 = vld [vmem:[#allocation3_spill] sm:$0xff] }
 0x1dc   : > { %v5672_v46 = vpop.f32.mrf.mxu1  ;;  %v2891_v5 = vadd.f32 %v7535_v16, %v7534_v7  ;;  %v3347_v15 = vadd.f32 %v7536_v4, %v2892_v20  ;;  %v7537_v61 = vld [vmem:[#allocation27_spill] sm:$0xff] }
 0x1dd   : > { %4412 = vst [vmem:[%s7135_s15 + $0x88] sm:$0xff] %v4380_v0  ;;  %v4379_v13 = vmax.f32 %v4347_v24, 0.0  ;;  %v4350_v11 = vadd.f32 %v7121_v58, %v4247_v30  ;;  %v4246_v59 = vadd.f32 %v4159_v3, %v3792_v47  ;;  %v3795_v54 = vadd.f32 %v5672_v46, %v3341_v23  ;;  %v4169_v32 = vpop.f32.mrf.mxu0  ;;  %v7538_v3 = vld [vmem:[#allocation15_spill] sm:$0xff]  ;;  %v7540_v46 = vld [vmem:[#allocation5_spill] sm:$0xff] }
 0x1de   : > { %v3715_v21 = vpop.f32.mrf.mxu1  ;;  %v2894_v0 = vadd.f32 %v7538_v3, %v7537_v61  ;;  %v3346_v55 = vadd.f32 %v7539_v6, %v2891_v5 }
 0x1df   : > { %4411 = vst [vmem:[%s7135_s15 + $0x80] sm:$0xff] %v4379_v13  ;;  %v4382_v14 = vmax.f32 %v4350_v11, 0.0  ;;  %v4349_v49 = vadd.f32 %v7121_v58, %v4246_v59  ;;  %v4249_v8 = vadd.f32 %v5722_v2, %v3795_v54  ;;  %v3794_v62 = vadd.f32 %v3715_v21, %v3340_v12  ;;  %v5725_v57 = vpop.f32.mrf.mxu0  ;;  %v7541_v2 = vld [vmem:[#allocation18_spill] sm:$0xff]  ;;  %v7543_v21 = vld [vmem:[#allocation28_spill] sm:$0xff] }
 0x1e0   : > { %v5675_v63 = vpop.f32.mrf.mxu1  ;;  %v2893_v13 = vadd.f32 %v7541_v2, %v7540_v46  ;;  %v3349_v43 = vadd.f32 %v7542_v36, %v2894_v0 }
 0x1e1   : > { %4414 = vst [vmem:[%s7135_s15 + $0x98] sm:$0xff] %v4382_v14  ;;  %v4381_v1 = vmax.f32 %v4349_v49, 0.0  ;;  %v4352_v10 = vadd.f32 %v7121_v58, %v4249_v8  ;;  %v4248_v38 = vadd.f32 %v4169_v32, %v3794_v62  ;;  %v3797_v28 = vadd.f32 %v5675_v63, %v3343_v44  ;;  %v4179_v60 = vpop.f32.mrf.mxu0  ;;  %v7546_v63 = vld [vmem:[#allocation42_spill] sm:$0xff] }
 0x1e2   : > { %v3725_v29 = vpop.f32.mrf.mxu1  ;;  %v2896_v32 = vadd.f32 %v7101_v35, %v7543_v21  ;;  %v3348_v25 = vadd.f32 %v7544_v41, %v2893_v13 }
 0x1e3   : > { %4413 = vst [vmem:[%s7135_s15 + $0x90] sm:$0xff] %v4381_v1  ;;  %v4384_v34 = vmax.f32 %v4352_v10, 0.0  ;;  %v4351_v52 = vadd.f32 %v7121_v58, %v4248_v38  ;;  %v4251_v39 = vadd.f32 %v5725_v57, %v3797_v28  ;;  %v3796_v56 = vadd.f32 %v3725_v29, %v3342_v18  ;;  %v5728_v33 = vpop.f32.mrf.mxu0 }
 0x1e4   : > { %v5678_v22 = vpop.f32.mrf.mxu1  ;;  %v2895_v57 = vadd.f32 %v7546_v63, %v7545_v48 }
 0x1e5   : > { %4416 = vst [vmem:[%s7135_s15 + $0xa8] sm:$0xff] %v4384_v34  ;;  %v4383_v50 = vmax.f32 %v4351_v52, 0.0  ;;  %v4354_v31 = vadd.f32 %v7121_v58, %v4251_v39  ;;  %v4250_v23 = vadd.f32 %v4179_v60, %v3796_v56  ;;  %v3799_v45 = vadd.f32 %v5678_v22, %v3345_v17  ;;  %v4189_v30 = vpop.f32.mrf.mxu0  ;;  %v7547_v17 = vld [vmem:[#allocation41_spill] sm:$0xff]  ;;  %v7548_v56 = vld [vmem:[#allocation43_spill] sm:$0xff] }
 0x1e6   : > { %v3735_v24 = vpop.f32.mrf.mxu1  ;;  %v3351_v9 = vadd.f32 %v7547_v17, %v2896_v32  ;;  %v3350_v27 = vadd.f32 %v7548_v56, %v2895_v57 }
 0x1e7   : > { %4415 = vst [vmem:[%s7135_s15 + $0xa0] sm:$0xff] %v4383_v50  ;;  %v4386_v47 = vmax.f32 %v4354_v31, 0.0  ;;  %v4353_v53 = vadd.f32 %v7121_v58, %v4250_v23  ;;  %v4253_v12 = vadd.f32 %v5728_v33, %v3799_v45  ;;  %v3798_v19 = vadd.f32 %v3735_v24, %v3344_v42  ;;  %v5731_v59 = vpop.f32.mrf.mxu0 }
 0x1e8   : > { %v5681_v11 = vpop.f32.mrf.mxu1 }
 0x1e9   : > { %4418 = vst [vmem:[%s7135_s15 + $0xb8] sm:$0xff] %v4386_v47  ;;  %v4385_v54 = vmax.f32 %v4353_v53, 0.0  ;;  %v4356_v40 = vadd.f32 %v7121_v58, %v4253_v12  ;;  %v4252_v44 = vadd.f32 %v4189_v30, %v3798_v19  ;;  %v3801_v26 = vadd.f32 %v5681_v11, %v3347_v15  ;;  %v4199_v49 = vpop.f32.mrf.mxu0 }
 0x1ea   : > { %v3745_v14 = vpop.f32.mrf.mxu1 }
 0x1eb   : > { %4417 = vst [vmem:[%s7135_s15 + $0xb0] sm:$0xff] %v4385_v54  ;;  %v4388_v8 = vmax.f32 %v4356_v40, 0.0  ;;  %v4355_v62 = vadd.f32 %v7121_v58, %v4252_v44  ;;  %v4255_v37 = vadd.f32 %v5731_v59, %v3801_v26  ;;  %v3800_v18 = vadd.f32 %v3745_v14, %v3346_v55  ;;  %v5734_v10 = vpop.f32.mrf.mxu0 }
 0x1ec   : > { %v5684_v1 = vpop.f32.mrf.mxu1 }
 0x1ed   : > { %4420 = vst [vmem:[%s7135_s15 + $0xc8] sm:$0xff] %v4388_v8  ;;  %v4387_v38 = vmax.f32 %v4355_v62, 0.0  ;;  %v4358_v35 = vadd.f32 %v7121_v58, %v4255_v37  ;;  %v4254_v28 = vadd.f32 %v4199_v49, %v3800_v18  ;;  %v3803_v51 = vadd.f32 %v5684_v1, %v3349_v43  ;;  %v4209_v29 = vpop.f32.mrf.mxu0 }
 0x1ee   : > { %v3755_v20 = vpop.f32.mrf.mxu1 }
 0x1ef   : > { %4419 = vst [vmem:[%s7135_s15 + $0xc0] sm:$0xff] %v4387_v38  ;;  %v4390_v60 = vmax.f32 %v4358_v35, 0.0  ;;  %v4357_v34 = vadd.f32 %v7121_v58, %v4254_v28  ;;  %v4257_v52 = vadd.f32 %v5734_v10, %v3803_v51  ;;  %v3802_v39 = vadd.f32 %v3755_v20, %v3348_v25  ;;  %v5737_v7 = vpop.f32.mrf.mxu0 }
 0x1f0   : > { %v5687_v42 = vpop.f32.mrf.mxu1 }
 0x1f1   : > { %4422 = vst [vmem:[%s7135_s15 + $0xd8] sm:$0xff] %v4390_v60  ;;  %v4389_v16 = vmax.f32 %v4357_v34, 0.0  ;;  %v4360_v5 = vadd.f32 %v7121_v58, %v4257_v52  ;;  %v4256_v22 = vadd.f32 %v4209_v29, %v3802_v39  ;;  %v3805_v33 = vadd.f32 %v5687_v42, %v3351_v9  ;;  %v4219_v15 = vpop.f32.mrf.mxu0 }
 0x1f2   : > { %v3765_v50 = vpop.f32.mrf.mxu1 }
 0x1f3   : > { %4421 = vst [vmem:[%s7135_s15 + $0xd0] sm:$0xff] %v4389_v16  ;;  %v4392_v31 = vmax.f32 %v4360_v5, 0.0  ;;  %v4359_v23 = vadd.f32 %v7121_v58, %v4256_v22  ;;  %v4259_v45 = vadd.f32 %v5737_v7, %v3805_v33  ;;  %v3804_v4 = vadd.f32 %v3765_v50, %v3350_v27 }
 0x1f5   : > { %4424 = vst [vmem:[%s7135_s15 + $0xe8] sm:$0xff] %v4392_v31  ;;  %v4391_v61 = vmax.f32 %v4359_v23, 0.0  ;;  %v4362_v3 = vadd.f32 %v7121_v58, %v4259_v45  ;;  %v4258_v0 = vadd.f32 %v4219_v15, %v3804_v4 }
 0x1f7   : > { %4423 = vst [vmem:[%s7135_s15 + $0xe0] sm:$0xff] %v4391_v61  ;;  %v4394_v24 = vmax.f32 %v4362_v3, 0.0  ;;  %v4361_v30 = vadd.f32 %v7121_v58, %v4258_v0 }
 0x1f9   : > { %4426 = vst [vmem:[%s7135_s15 + $0xf8] sm:$0xff] %v4394_v24  ;;  %v4393_v47 = vmax.f32 %v4361_v30, 0.0 }
 0x1fb   : > { %4425 = vst [vmem:[%s7135_s15 + $0xf0] sm:$0xff] %v4393_v47 }
 0x1fc PF: > { %s13_s12 = sadd.s32 1, %s5755_s12  }
 0x1fd   : > { %p10_p4 = scmp.ge.s32.totalorder %s13_s12, 4  }
 0x1ff   :  { %12 = sbr.rel (!%p10_p4) target bundleno = 1 (0x1), region = 72 }

</bundles_post_ra>
